<compile_context>
chip_gen: v7x
topology: tpu7x:2x2x1
jax: 0.10.0
libtpu: 0.0.40
codegen_flags: <defaults>
</compile_context>

<pallas_src>
import functools
import math

import jax
import jax.numpy as jnp
from jax import lax
from jax.experimental import pallas as pl
from jax.experimental.pallas import tpu as pltpu


# ----------------------------------------------------------------------------- kernel body


def _attn_core(q_ref, k_ref, v_ref, bias_ref,
               wq_ref, bq_ref, wk_ref, bk_ref, wv_ref, bv_ref,
               wo_ref, bo_ref, gamma_ref, beta_ref,
               *, num_head, dim_k, dim_v, eps, matmul_dtype, approx_recip):
    """Returns (out (Bt,S,E) f32, attn (H,Bt,Sq,Sk) f32) for one block of Bt batch elements."""
    Bt, S, E = q_ref.shape
    H, Dk, Dv = num_head, dim_k, dim_v

    x2 = q_ref[...].astype(jnp.float32).reshape(Bt * S, E)   # residual input
    k2 = k_ref[...].astype(jnp.float32).reshape(Bt * S, E)
    v2 = v_ref[...].astype(jnp.float32).reshape(Bt * S, E)

    def mm(a, b):  # lane-dense 2D matmul, f32 accumulation on the MXU
        return jnp.dot(a.astype(matmul_dtype), b.astype(matmul_dtype),
                       preferred_element_type=jnp.float32)

    # Wide projections: one matmul each (1/sqrt(Dk) pre-folded into wq/bq on the host).
    qp = mm(x2, wq_ref[...]) + bq_ref[...]          # (Bt*S, H*Dk)
    kp = mm(k2, wk_ref[...]) + bk_ref[...]          # (Bt*S, H*Dk)
    vp = mm(v2, wv_ref[...]) + bv_ref[...]          # (Bt*S, H*Dv)

    # Split heads with static lane slices + a leading-axis stack -> (H*Bt, S, D), head-major.
    def split_heads(p, d):
        parts = [p[:, h * d:(h + 1) * d] for h in range(H)]
        return jnp.stack(parts, axis=0).reshape(H * Bt, S, d)

    qh = split_heads(qp, Dk)
    kh = split_heads(kp, Dk)
    vh = split_heads(vp, Dv)

    # Scores, batched over (head, batch): 'bqd,bkd->bqk'.
    s = lax.dot_general(qh.astype(matmul_dtype), kh.astype(matmul_dtype),
                        dimension_numbers=(((2,), (2,)), ((0,), (0,))),
                        preferred_element_type=jnp.float32)            # (H*Bt, Sq, Sk)
    s = s.reshape(H, Bt, S, S) + bias_ref[...][None]                   # additive mask bias

    # Softmax over Sk (f32; max-subtracted; reciprocal runs on the EUP).
    m = jnp.max(s, axis=-1, keepdims=True)
    e = jnp.exp(s - m)
    denom = jnp.sum(e, axis=-1, keepdims=True)
    attn = e * pl.reciprocal(denom, approx=approx_recip)               # (H, Bt, Sq, Sk)

    # Context per (head, batch): 'bqk,bkd->bqd'.
    a = lax.dot_general(attn.reshape(H * Bt, S, S).astype(matmul_dtype),
                        vh.astype(matmul_dtype),
                        dimension_numbers=(((2,), (1,)), ((0,), (0,))),
                        preferred_element_type=jnp.float32)            # (H*Bt, Sq, Dv)

    # Re-concatenate heads along lanes -> one dense output projection.
    a = a.reshape(H, Bt * S, Dv)
    a_cat = jnp.concatenate([a[h] for h in range(H)], axis=-1)         # (Bt*S, H*Dv)
    ao = mm(a_cat, wo_ref[...]) + bo_ref[...]                          # (Bt*S, E)

    # Dropout = identity (eval).  Residual + LayerNorm (f32 statistics, rsqrt on EUP).
    y = x2 + ao
    mu = jnp.mean(y, axis=-1, keepdims=True)
    var = jnp.mean(jnp.square(y - mu), axis=-1, keepdims=True)
    out = (y - mu) * lax.rsqrt(var + eps) * gamma_ref[...] + beta_ref[...]
    return out.reshape(Bt, S, E), attn


def _attn_block_kernel(q_ref, k_ref, v_ref, bias_ref,
                       wq_ref, bq_ref, wk_ref, bk_ref, wv_ref, bv_ref,
                       wo_ref, bo_ref, gamma_ref, beta_ref,
                       out_ref, aw_ref,
                       *, num_head, dim_k, dim_v, eps, matmul_dtype, approx_recip):
    out, attn = _attn_core(q_ref, k_ref, v_ref, bias_ref,
                           wq_ref, bq_ref, wk_ref, bk_ref, wv_ref, bv_ref,
                           wo_ref, bo_ref, gamma_ref, beta_ref,
                           num_head=num_head, dim_k=dim_k, dim_v=dim_v, eps=eps,
                           matmul_dtype=matmul_dtype, approx_recip=approx_recip)
    out_ref[...] = out.astype(out_ref.dtype)
    for h in range(num_head):                                   # (Bt, Sq, Sk) store per head
        aw_ref[:, h, :, :] = attn[h].astype(aw_ref.dtype)


def _attn_block_kernel_no_aw(q_ref, k_ref, v_ref, bias_ref,
                             wq_ref, bq_ref, wk_ref, bk_ref, wv_ref, bv_ref,
                             wo_ref, bo_ref, gamma_ref, beta_ref,
                             out_ref,
                             *, num_head, dim_k, dim_v, eps, matmul_dtype, approx_recip):
    out, _ = _attn_core(q_ref, k_ref, v_ref, bias_ref,
                        wq_ref, bq_ref, wk_ref, bk_ref, wv_ref, bv_ref,
                        wo_ref, bo_ref, gamma_ref, beta_ref,
                        num_head=num_head, dim_k=dim_k, dim_v=dim_v, eps=eps,
                        matmul_dtype=matmul_dtype, approx_recip=approx_recip)
    out_ref[...] = out.astype(out_ref.dtype)


# ----------------------------------------------------------------------------- host wrapper


def _pick_block_b(B, S, target_rows=256):
    """Largest divisor of B such that block_b * S stays a modest MXU M-dimension."""
    best = 1
    for bt in range(1, B + 1):
        if B % bt == 0 and bt * S <= max(target_rows, S):
            best = bt
    return best


def _prepare_inputs(q, mask, params, *, num_head, dim_k, dim_v, matmul_dtype):
    """Host-side re-layout: wide pre-transposed weights, scale folded into Wq/bq, mask bias."""
    B, S, E = q.shape
    f32 = jnp.float32
    scale = f32(1.0 / math.sqrt(dim_k))
    wq = (params["wq"].astype(f32) * scale).T.astype(matmul_dtype)      # (E, H*Dk), scaled
    bq = (params["bq"].astype(f32) * scale).reshape(1, num_head * dim_k)
    wk = params["wk"].T.astype(matmul_dtype)                            # (E, H*Dk)
    bk = params["bk"].astype(f32).reshape(1, num_head * dim_k)
    wv = params["wv"].T.astype(matmul_dtype)                            # (E, H*Dv)
    bv = params["bv"].astype(f32).reshape(1, num_head * dim_v)
    wo = params["wo"].T.astype(matmul_dtype)                            # (H*Dv, E)
    bo = params["bo"].astype(f32).reshape(1, E)
    gamma = params["gamma"].astype(f32).reshape(1, E)
    beta = params["beta"].astype(f32).reshape(1, E)
    if mask is None:
        bias = jnp.zeros((B, S, S), f32)
    else:
        bias = jnp.where(mask == 0, f32(-1e9), f32(0.0))                # additive mask bias
    return bias, (wq, bq, wk, bk, wv, bv, wo, bo, gamma, beta)


def attention_block_pallas(q, k, v, mask, params, *, num_head, dim_k, dim_v,
                           return_attention_weights=True, eps=1e-5,
                           matmul_dtype=jnp.float32,
                           attention_weights_dtype=jnp.float32,
                           block_b=None):
    """q, k, v: (B, S, E) float32; mask: (B, Sq, Sk) int (0 = masked) or None."""
    B, S, E = q.shape
    H = num_head
    if block_b is None:
        block_b = _pick_block_b(B, S)
    assert B % block_b == 0, "block_b must divide the batch size"
    Bt = block_b

    bias, weights = _prepare_inputs(q, mask, params, num_head=H, dim_k=dim_k,
                                    dim_v=dim_v, matmul_dtype=matmul_dtype)

    def const_spec(a):
        nd = a.ndim
        return pl.BlockSpec(a.shape, lambda b, _nd=nd: (0,) * _nd)

    # NOTE: on v7x these constant-index weight specs could be single-buffered via
    # pipeline_mode=pl.Buffered(1) to cut their VMEM footprint in half; default kept here.
    in_specs = [
        pl.BlockSpec((Bt, S, E), lambda b: (b, 0, 0)),   # q (residual)
        pl.BlockSpec((Bt, S, E), lambda b: (b, 0, 0)),   # k
        pl.BlockSpec((Bt, S, E), lambda b: (b, 0, 0)),   # v
        pl.BlockSpec((Bt, S, S), lambda b: (b, 0, 0)),   # additive mask bias
    ] + [const_spec(w) for w in weights]

    args = (q, k, v, bias, *weights)
    grid = (B // Bt,)
    cparams = pltpu.CompilerParams(
        dimension_semantics=("parallel",),               # disjoint per-batch-block outputs
        vmem_limit_bytes=48 * 1024 * 1024)               # > all chips' scoped default, < physical
    common = dict(num_head=H, dim_k=dim_k, dim_v=dim_v, eps=eps, matmul_dtype=matmul_dtype)

    if return_attention_weights:
        kernel = functools.partial(_attn_block_kernel, approx_recip=False, **common)
        out, aw = pl.pallas_call(
            kernel,
            out_shape=(
                jax.ShapeDtypeStruct((B, S, E), jnp.float32),
                jax.ShapeDtypeStruct((B, H, S, S), attention_weights_dtype),
            ),
            grid=grid,
            in_specs=in_specs,
            out_specs=(
                pl.BlockSpec((Bt, S, E), lambda b: (b, 0, 0)),
                pl.BlockSpec((Bt, H, S, S), lambda b: (b, 0, 0, 0)),
            ),
            compiler_params=cparams,
        )(*args)
        return out, aw
    else:
        kernel = functools.partial(_attn_block_kernel_no_aw, approx_recip=True, **common)
        out = pl.pallas_call(
            kernel,
            out_shape=jax.ShapeDtypeStruct((B, S, E), jnp.float32),
            grid=grid,
            in_specs=in_specs,
            out_specs=pl.BlockSpec((Bt, S, E), lambda b: (b, 0, 0)),
            compiler_params=cparams,
        )(*args)
        return out, None


# ----------------------------------------------------------------------------- reference


def attention_block_reference(q, k, v, mask, params, *, num_head, dim_k, dim_v, eps=1e-5):
    """Pure-JAX mirror of the PyTorch forward (eval mode) for verification."""
    B, S, E = q.shape
    x = q
    qp = q @ params["wq"].T + params["bq"]
    kp = k @ params["wk"].T + params["bk"]
    vp = v @ params["wv"].T + params["bv"]
    qh = qp.reshape(B, S, num_head, dim_k).transpose(0, 2, 1, 3)
    kh = kp.reshape(B, S, num_head, dim_k).transpose(0, 2, 1, 3)
    vh = vp.reshape(B, S, num_head, dim_v).transpose(0, 2, 1, 3)
    s = jnp.einsum("bhqd,bhkd->bhqk", qh, kh) / math.sqrt(dim_k)
    if mask is not None:
        s = jnp.where(mask[:, None, :, :] == 0, -1e9, s)
    aw = jax.nn.softmax(s, axis=-1)
    a = jnp.einsum("bhqk,bhkd->bhqd", aw, vh)
    a = a.transpose(0, 2, 1, 3).reshape(B, S, num_head * dim_v)
    ao = a @ params["wo"].T + params["bo"]
    y = x + ao
    mu = jnp.mean(y, axis=-1, keepdims=True)
    var = jnp.mean((y - mu) ** 2, axis=-1, keepdims=True)
    out = (y - mu) / jnp.sqrt(var + eps) * params["gamma"] + params["beta"]
    return out, aw


# ----------------------------------------------------------------------------- demo / test


if __name__ == "__main__":
    B, S, E = 2, 8, 32          # batch, sequence length, embedding size
    H, Dk, Dv = 4, 8, 8         # num heads, per-head key/value dims

    key = jax.random.PRNGKey(0)
    keys = jax.random.split(key, 11)
    params = {
        "wq": 0.05 * jax.random.normal(keys[0], (H * Dk, E), jnp.float32),
        "bq": 0.05 * jax.random.normal(keys[1], (H * Dk,), jnp.float32),
        "wk": 0.05 * jax.random.normal(keys[2], (H * Dk, E), jnp.float32),
        "bk": 0.05 * jax.random.normal(keys[3], (H * Dk,), jnp.float32),
        "wv": 0.05 * jax.random.normal(keys[4], (H * Dv, E), jnp.float32),
        "bv": 0.05 * jax.random.normal(keys[5], (H * Dv,), jnp.float32),
        "wo": 0.05 * jax.random.normal(keys[6], (E, H * Dv), jnp.float32),
        "bo": 0.05 * jax.random.normal(keys[7], (E,), jnp.float32),
        "gamma": jnp.ones((E,), jnp.float32),
        "beta": jnp.zeros((E,), jnp.float32),
    }
    q = jax.random.normal(keys[8], (B, S, E), jnp.float32)
    k = jax.random.normal(keys[9], (B, S, E), jnp.float32)
    v = jax.random.normal(keys[10], (B, S, E), jnp.float32)
    mask = jnp.broadcast_to(jnp.tril(jnp.ones((S, S), jnp.int32)), (B, S, S))  # causal-ish

    ref_out, ref_aw = attention_block_reference(q, k, v, mask, params,
                                                num_head=H, dim_k=Dk, dim_v=Dv)

    # Full-fidelity path: f32 matmuls, returns attention weights (matches the module API).
    out, aw = attention_block_pallas(q, k, v, mask, params,
                                     num_head=H, dim_k=Dk, dim_v=Dv)
    out = jax.block_until_ready(out)
    aw = jax.block_until_ready(aw)
    assert out.shape == (B, S, E) and aw.shape == (B, H, S, S)
    assert jnp.allclose(out, ref_out, atol=1e-4, rtol=1e-4)
    assert jnp.allclose(aw, ref_aw, atol=1e-5, rtol=1e-5)

    # Output-only path (skips the dominant (B,H,S,S) HBM write; approx EUP reciprocal).
    out_only, _ = attention_block_pallas(q, k, v, mask, params,
                                         num_head=H, dim_k=Dk, dim_v=Dv,
                                         return_attention_weights=False)
    out_only = jax.block_until_ready(out_only)
    assert jnp.allclose(out_only, ref_out, atol=1e-2, rtol=1e-2)

    # bf16 MXU path (recommended on v6e/v7x); accumulation / softmax / LayerNorm stay f32.
    out_bf16, _ = attention_block_pallas(q, k, v, mask, params,
                                         num_head=H, dim_k=Dk, dim_v=Dv,
                                         return_attention_weights=False,
                                         matmul_dtype=jnp.bfloat16)
    out_bf16 = jax.block_until_ready(out_bf16)
    assert bool(jnp.all(jnp.isfinite(out_bf16)))
    assert jnp.allclose(out_bf16, ref_out, atol=1e-1, rtol=1e-1)

    print("KERNEL_OK")
</pallas_src>

<mosaic_0001>
module attributes {stable_mosaic.version = 11 : i64} {
  func.func @_attn_block_kernel(%arg0: i32, %arg1: memref<2x8x32xf32, #tpu.memory_space<vmem>>, %arg2: memref<2x8x32xf32, #tpu.memory_space<vmem>>, %arg3: memref<2x8x32xf32, #tpu.memory_space<vmem>>, %arg4: memref<2x8x8xf32, #tpu.memory_space<vmem>>, %arg5: memref<32x32xf32, #tpu.memory_space<vmem>>, %arg6: memref<1x32xf32, #tpu.memory_space<vmem>>, %arg7: memref<32x32xf32, #tpu.memory_space<vmem>>, %arg8: memref<1x32xf32, #tpu.memory_space<vmem>>, %arg9: memref<32x32xf32, #tpu.memory_space<vmem>>, %arg10: memref<1x32xf32, #tpu.memory_space<vmem>>, %arg11: memref<32x32xf32, #tpu.memory_space<vmem>>, %arg12: memref<1x32xf32, #tpu.memory_space<vmem>>, %arg13: memref<1x32xf32, #tpu.memory_space<vmem>>, %arg14: memref<1x32xf32, #tpu.memory_space<vmem>>, %arg15: memref<2x8x32xf32, #tpu.memory_space<vmem>>, %arg16: memref<2x4x8x8xf32, #tpu.memory_space<vmem>>) attributes {dimension_semantics = [#tpu.dimension_semantics<parallel>], iteration_bounds = array<i64: 1>, scalar_prefetch = 0 : i64, scratch_operands = 0 : i64, tpu.core_type = #tpu.core_type<tc>, window_params = [{transform_indices = @transform_0, window_bounds = array<i64: 2, 8, 32>}, {transform_indices = @transform_1, window_bounds = array<i64: 2, 8, 32>}, {transform_indices = @transform_2, window_bounds = array<i64: 2, 8, 32>}, {transform_indices = @transform_3, window_bounds = array<i64: 2, 8, 8>}, {pipeline_mode = #tpu.pipeline_mode<synchronous>, transform_indices = @transform_4, window_bounds = array<i64: 32, 32>}, {pipeline_mode = #tpu.pipeline_mode<synchronous>, transform_indices = @transform_5, window_bounds = array<i64: 1, 32>}, {pipeline_mode = #tpu.pipeline_mode<synchronous>, transform_indices = @transform_6, window_bounds = array<i64: 32, 32>}, {pipeline_mode = #tpu.pipeline_mode<synchronous>, transform_indices = @transform_7, window_bounds = array<i64: 1, 32>}, {pipeline_mode = #tpu.pipeline_mode<synchronous>, transform_indices = @transform_8, window_bounds = array<i64: 32, 32>}, {pipeline_mode = #tpu.pipeline_mode<synchronous>, transform_indices = @transform_9, window_bounds = array<i64: 1, 32>}, {pipeline_mode = #tpu.pipeline_mode<synchronous>, transform_indices = @transform_10, window_bounds = array<i64: 32, 32>}, {pipeline_mode = #tpu.pipeline_mode<synchronous>, transform_indices = @transform_11, window_bounds = array<i64: 1, 32>}, {pipeline_mode = #tpu.pipeline_mode<synchronous>, transform_indices = @transform_12, window_bounds = array<i64: 1, 32>}, {pipeline_mode = #tpu.pipeline_mode<synchronous>, transform_indices = @transform_13, window_bounds = array<i64: 1, 32>}, {transform_indices = @transform_14, window_bounds = array<i64: 2, 8, 32>}, {transform_indices = @transform_15, window_bounds = array<i64: 2, 4, 8, 8>}]} {
    %c0 = arith.constant 0 : index
    %c0_0 = arith.constant 0 : index
    %c0_1 = arith.constant 0 : index
    %0 = vector.load %arg1[%c0, %c0_0, %c0_1] : memref<2x8x32xf32, #tpu.memory_space<vmem>>, vector<2x8x32xf32>
    %1 = vector.shape_cast %0 : vector<2x8x32xf32> to vector<16x32xf32>
    %c0_2 = arith.constant 0 : index
    %c0_3 = arith.constant 0 : index
    %c0_4 = arith.constant 0 : index
    %2 = vector.load %arg2[%c0_2, %c0_3, %c0_4] : memref<2x8x32xf32, #tpu.memory_space<vmem>>, vector<2x8x32xf32>
    %3 = vector.shape_cast %2 : vector<2x8x32xf32> to vector<16x32xf32>
    %c0_5 = arith.constant 0 : index
    %c0_6 = arith.constant 0 : index
    %c0_7 = arith.constant 0 : index
    %4 = vector.load %arg3[%c0_5, %c0_6, %c0_7] : memref<2x8x32xf32, #tpu.memory_space<vmem>>, vector<2x8x32xf32>
    %5 = vector.shape_cast %4 : vector<2x8x32xf32> to vector<16x32xf32>
    %c0_8 = arith.constant 0 : index
    %c0_9 = arith.constant 0 : index
    %6 = vector.load %arg5[%c0_8, %c0_9] : memref<32x32xf32, #tpu.memory_space<vmem>>, vector<32x32xf32>
    %cst = arith.constant dense<0.000000e+00> : vector<16x32xf32>
    %7 = tpu.matmul %1, %6, %cst {dimension_numbers = #tpu.dot_dimension_numbers<[1], [0], [0], [1], [0, 0, 1, 1], [], []>} : vector<16x32xf32>, vector<32x32xf32>, vector<16x32xf32> -> vector<16x32xf32>
    %c0_10 = arith.constant 0 : index
    %c0_11 = arith.constant 0 : index
    %8 = vector.load %arg6[%c0_10, %c0_11] : memref<1x32xf32, #tpu.memory_space<vmem>>, vector<1x32xf32>
    %9 = vector.broadcast %8 : vector<1x32xf32> to vector<16x32xf32>
    %10 = arith.addf %7, %9 : vector<16x32xf32>
    %c0_12 = arith.constant 0 : index
    %c0_13 = arith.constant 0 : index
    %11 = vector.load %arg7[%c0_12, %c0_13] : memref<32x32xf32, #tpu.memory_space<vmem>>, vector<32x32xf32>
    %cst_14 = arith.constant dense<0.000000e+00> : vector<16x32xf32>
    %12 = tpu.matmul %3, %11, %cst_14 {dimension_numbers = #tpu.dot_dimension_numbers<[1], [0], [0], [1], [0, 0, 1, 1], [], []>} : vector<16x32xf32>, vector<32x32xf32>, vector<16x32xf32> -> vector<16x32xf32>
    %c0_15 = arith.constant 0 : index
    %c0_16 = arith.constant 0 : index
    %13 = vector.load %arg8[%c0_15, %c0_16] : memref<1x32xf32, #tpu.memory_space<vmem>>, vector<1x32xf32>
    %14 = vector.broadcast %13 : vector<1x32xf32> to vector<16x32xf32>
    %15 = arith.addf %12, %14 : vector<16x32xf32>
    %c0_17 = arith.constant 0 : index
    %c0_18 = arith.constant 0 : index
    %16 = vector.load %arg9[%c0_17, %c0_18] : memref<32x32xf32, #tpu.memory_space<vmem>>, vector<32x32xf32>
    %cst_19 = arith.constant dense<0.000000e+00> : vector<16x32xf32>
    %17 = tpu.matmul %5, %16, %cst_19 {dimension_numbers = #tpu.dot_dimension_numbers<[1], [0], [0], [1], [0, 0, 1, 1], [], []>} : vector<16x32xf32>, vector<32x32xf32>, vector<16x32xf32> -> vector<16x32xf32>
    %c0_20 = arith.constant 0 : index
    %c0_21 = arith.constant 0 : index
    %18 = vector.load %arg10[%c0_20, %c0_21] : memref<1x32xf32, #tpu.memory_space<vmem>>, vector<1x32xf32>
    %19 = vector.broadcast %18 : vector<1x32xf32> to vector<16x32xf32>
    %20 = arith.addf %17, %19 : vector<16x32xf32>
    %21 = vector.extract_strided_slice %10 {offsets = [0, 0], sizes = [16, 8], strides = [1, 1]} : vector<16x32xf32> to vector<16x8xf32>
    %22 = vector.extract_strided_slice %10 {offsets = [0, 8], sizes = [16, 8], strides = [1, 1]} : vector<16x32xf32> to vector<16x8xf32>
    %23 = vector.extract_strided_slice %10 {offsets = [0, 16], sizes = [16, 8], strides = [1, 1]} : vector<16x32xf32> to vector<16x8xf32>
    %24 = vector.extract_strided_slice %10 {offsets = [0, 24], sizes = [16, 8], strides = [1, 1]} : vector<16x32xf32> to vector<16x8xf32>
    %25 = vector.shape_cast %21 : vector<16x8xf32> to vector<1x16x8xf32>
    %26 = vector.shape_cast %22 : vector<16x8xf32> to vector<1x16x8xf32>
    %27 = vector.shape_cast %23 : vector<16x8xf32> to vector<1x16x8xf32>
    %28 = vector.shape_cast %24 : vector<16x8xf32> to vector<1x16x8xf32>
    %29 = tpu.concatenate %25, %26, %27, %28 in 0 : vector<1x16x8xf32>, vector<1x16x8xf32>, vector<1x16x8xf32>, vector<1x16x8xf32> -> vector<4x16x8xf32>
    %30 = vector.shape_cast %29 : vector<4x16x8xf32> to vector<8x8x8xf32>
    %31 = vector.extract_strided_slice %15 {offsets = [0, 0], sizes = [16, 8], strides = [1, 1]} : vector<16x32xf32> to vector<16x8xf32>
    %32 = vector.extract_strided_slice %15 {offsets = [0, 8], sizes = [16, 8], strides = [1, 1]} : vector<16x32xf32> to vector<16x8xf32>
    %33 = vector.extract_strided_slice %15 {offsets = [0, 16], sizes = [16, 8], strides = [1, 1]} : vector<16x32xf32> to vector<16x8xf32>
    %34 = vector.extract_strided_slice %15 {offsets = [0, 24], sizes = [16, 8], strides = [1, 1]} : vector<16x32xf32> to vector<16x8xf32>
    %35 = vector.shape_cast %31 : vector<16x8xf32> to vector<1x16x8xf32>
    %36 = vector.shape_cast %32 : vector<16x8xf32> to vector<1x16x8xf32>
    %37 = vector.shape_cast %33 : vector<16x8xf32> to vector<1x16x8xf32>
    %38 = vector.shape_cast %34 : vector<16x8xf32> to vector<1x16x8xf32>
    %39 = tpu.concatenate %35, %36, %37, %38 in 0 : vector<1x16x8xf32>, vector<1x16x8xf32>, vector<1x16x8xf32>, vector<1x16x8xf32> -> vector<4x16x8xf32>
    %40 = vector.shape_cast %39 : vector<4x16x8xf32> to vector<8x8x8xf32>
    %41 = vector.extract_strided_slice %20 {offsets = [0, 0], sizes = [16, 8], strides = [1, 1]} : vector<16x32xf32> to vector<16x8xf32>
    %42 = vector.extract_strided_slice %20 {offsets = [0, 8], sizes = [16, 8], strides = [1, 1]} : vector<16x32xf32> to vector<16x8xf32>
    %43 = vector.extract_strided_slice %20 {offsets = [0, 16], sizes = [16, 8], strides = [1, 1]} : vector<16x32xf32> to vector<16x8xf32>
    %44 = vector.extract_strided_slice %20 {offsets = [0, 24], sizes = [16, 8], strides = [1, 1]} : vector<16x32xf32> to vector<16x8xf32>
    %45 = vector.shape_cast %41 : vector<16x8xf32> to vector<1x16x8xf32>
    %46 = vector.shape_cast %42 : vector<16x8xf32> to vector<1x16x8xf32>
    %47 = vector.shape_cast %43 : vector<16x8xf32> to vector<1x16x8xf32>
    %48 = vector.shape_cast %44 : vector<16x8xf32> to vector<1x16x8xf32>
    %49 = tpu.concatenate %45, %46, %47, %48 in 0 : vector<1x16x8xf32>, vector<1x16x8xf32>, vector<1x16x8xf32>, vector<1x16x8xf32> -> vector<4x16x8xf32>
    %50 = vector.shape_cast %49 : vector<4x16x8xf32> to vector<8x8x8xf32>
    %cst_22 = arith.constant dense<0.000000e+00> : vector<8x8x8xf32>
    %51 = tpu.matmul %30, %40, %cst_22 {dimension_numbers = #tpu.dot_dimension_numbers<[2], [2], [1], [1], [0, 0, 0, 1, 1, 1], [0], [0]>} : vector<8x8x8xf32>, vector<8x8x8xf32>, vector<8x8x8xf32> -> vector<8x8x8xf32>
    %52 = vector.shape_cast %51 : vector<8x8x8xf32> to vector<4x2x8x8xf32>
    %c0_23 = arith.constant 0 : index
    %c0_24 = arith.constant 0 : index
    %c0_25 = arith.constant 0 : index
    %53 = vector.load %arg4[%c0_23, %c0_24, %c0_25] : memref<2x8x8xf32, #tpu.memory_space<vmem>>, vector<2x8x8xf32>
    %54 = vector.shape_cast %53 : vector<2x8x8xf32> to vector<1x2x8x8xf32>
    %55 = vector.broadcast %54 : vector<1x2x8x8xf32> to vector<4x2x8x8xf32>
    %56 = arith.addf %52, %55 : vector<4x2x8x8xf32>
    %cst_26 = arith.constant dense<0xFF800000> : vector<4x2x8xf32>
    %57 = vector.multi_reduction <maximumf>, %56, %cst_26 [3] : vector<4x2x8x8xf32> to vector<4x2x8xf32>
    %58 = vector.shape_cast %57 : vector<4x2x8xf32> to vector<4x2x8x1xf32>
    %59 = vector.broadcast %58 : vector<4x2x8x1xf32> to vector<4x2x8x8xf32>
    %60 = arith.subf %56, %59 : vector<4x2x8x8xf32>
    %61 = math.exp %60 : vector<4x2x8x8xf32>
    %cst_27 = arith.constant dense<0.000000e+00> : vector<4x2x8xf32>
    %62 = vector.multi_reduction <add>, %61, %cst_27 [3] : vector<4x2x8x8xf32> to vector<4x2x8xf32>
    %63 = vector.shape_cast %62 : vector<4x2x8xf32> to vector<4x2x8x1xf32>
    %64 = tpu.reciprocal %63 : vector<4x2x8x1xf32> -> vector<4x2x8x1xf32>
    %65 = vector.broadcast %64 : vector<4x2x8x1xf32> to vector<4x2x8x8xf32>
    %66 = arith.mulf %61, %65 : vector<4x2x8x8xf32>
    %67 = vector.shape_cast %66 : vector<4x2x8x8xf32> to vector<8x8x8xf32>
    %cst_28 = arith.constant dense<0.000000e+00> : vector<8x8x8xf32>
    %68 = tpu.matmul %67, %50, %cst_28 {dimension_numbers = #tpu.dot_dimension_numbers<[2], [1], [1], [2], [0, 0, 0, 1, 1, 2], [0], [0]>} : vector<8x8x8xf32>, vector<8x8x8xf32>, vector<8x8x8xf32> -> vector<8x8x8xf32>
    %69 = vector.shape_cast %68 : vector<8x8x8xf32> to vector<4x16x8xf32>
    %70 = vector.extract_strided_slice %69 {offsets = [0, 0, 0], sizes = [1, 16, 8], strides = [1, 1, 1]} : vector<4x16x8xf32> to vector<1x16x8xf32>
    %71 = vector.shape_cast %70 : vector<1x16x8xf32> to vector<16x8xf32>
    %72 = vector.extract_strided_slice %69 {offsets = [1, 0, 0], sizes = [1, 16, 8], strides = [1, 1, 1]} : vector<4x16x8xf32> to vector<1x16x8xf32>
    %73 = vector.shape_cast %72 : vector<1x16x8xf32> to vector<16x8xf32>
    %74 = vector.extract_strided_slice %69 {offsets = [2, 0, 0], sizes = [1, 16, 8], strides = [1, 1, 1]} : vector<4x16x8xf32> to vector<1x16x8xf32>
    %75 = vector.shape_cast %74 : vector<1x16x8xf32> to vector<16x8xf32>
    %76 = vector.extract_strided_slice %69 {offsets = [3, 0, 0], sizes = [1, 16, 8], strides = [1, 1, 1]} : vector<4x16x8xf32> to vector<1x16x8xf32>
    %77 = vector.shape_cast %76 : vector<1x16x8xf32> to vector<16x8xf32>
    %78 = tpu.concatenate %71, %73, %75, %77 in 1 : vector<16x8xf32>, vector<16x8xf32>, vector<16x8xf32>, vector<16x8xf32> -> vector<16x32xf32>
    %c0_29 = arith.constant 0 : index
    %c0_30 = arith.constant 0 : index
    %79 = vector.load %arg11[%c0_29, %c0_30] : memref<32x32xf32, #tpu.memory_space<vmem>>, vector<32x32xf32>
    %cst_31 = arith.constant dense<0.000000e+00> : vector<16x32xf32>
    %80 = tpu.matmul %78, %79, %cst_31 {dimension_numbers = #tpu.dot_dimension_numbers<[1], [0], [0], [1], [0, 0, 1, 1], [], []>} : vector<16x32xf32>, vector<32x32xf32>, vector<16x32xf32> -> vector<16x32xf32>
    %c0_32 = arith.constant 0 : index
    %c0_33 = arith.constant 0 : index
    %81 = vector.load %arg12[%c0_32, %c0_33] : memref<1x32xf32, #tpu.memory_space<vmem>>, vector<1x32xf32>
    %82 = vector.broadcast %81 : vector<1x32xf32> to vector<16x32xf32>
    %83 = arith.addf %80, %82 : vector<16x32xf32>
    %84 = arith.addf %1, %83 : vector<16x32xf32>
    %cst_34 = arith.constant dense<0.000000e+00> : vector<16xf32>
    %85 = vector.multi_reduction <add>, %84, %cst_34 [1] : vector<16x32xf32> to vector<16xf32>
    %86 = vector.shape_cast %85 : vector<16xf32> to vector<16x1xf32>
    %cst_35 = arith.constant 3.200000e+01 : f32
    %87 = vector.broadcast %cst_35 : f32 to vector<16x1xf32>
    %88 = arith.divf %86, %87 : vector<16x1xf32>
    %89 = vector.broadcast %88 : vector<16x1xf32> to vector<16x32xf32>
    %90 = arith.subf %84, %89 : vector<16x32xf32>
    %91 = arith.mulf %90, %90 : vector<16x32xf32>
    %cst_36 = arith.constant dense<0.000000e+00> : vector<16xf32>
    %92 = vector.multi_reduction <add>, %91, %cst_36 [1] : vector<16x32xf32> to vector<16xf32>
    %93 = vector.shape_cast %92 : vector<16xf32> to vector<16x1xf32>
    %cst_37 = arith.constant 3.200000e+01 : f32
    %94 = vector.broadcast %cst_37 : f32 to vector<16x1xf32>
    %95 = arith.divf %93, %94 : vector<16x1xf32>
    %96 = vector.broadcast %88 : vector<16x1xf32> to vector<16x32xf32>
    %97 = arith.subf %84, %96 : vector<16x32xf32>
    %cst_38 = arith.constant 9.99999974E-6 : f32
    %98 = vector.broadcast %cst_38 : f32 to vector<16x1xf32>
    %99 = arith.addf %95, %98 : vector<16x1xf32>
    %100 = math.rsqrt %99 : vector<16x1xf32>
    %101 = vector.broadcast %100 : vector<16x1xf32> to vector<16x32xf32>
    %102 = arith.mulf %97, %101 : vector<16x32xf32>
    %c0_39 = arith.constant 0 : index
    %c0_40 = arith.constant 0 : index
    %103 = vector.load %arg13[%c0_39, %c0_40] : memref<1x32xf32, #tpu.memory_space<vmem>>, vector<1x32xf32>
    %104 = vector.broadcast %103 : vector<1x32xf32> to vector<16x32xf32>
    %105 = arith.mulf %102, %104 : vector<16x32xf32>
    %c0_41 = arith.constant 0 : index
    %c0_42 = arith.constant 0 : index
    %106 = vector.load %arg14[%c0_41, %c0_42] : memref<1x32xf32, #tpu.memory_space<vmem>>, vector<1x32xf32>
    %107 = vector.broadcast %106 : vector<1x32xf32> to vector<16x32xf32>
    %108 = arith.addf %105, %107 : vector<16x32xf32>
    %109 = vector.shape_cast %108 : vector<16x32xf32> to vector<2x8x32xf32>
    %c0_43 = arith.constant 0 : index
    %c0_44 = arith.constant 0 : index
    %c0_45 = arith.constant 0 : index
    %110 = vector.load %arg15[%c0_43, %c0_44, %c0_45] : memref<2x8x32xf32, #tpu.memory_space<vmem>>, vector<2x8x32xf32>
    tpu.vector_store %arg15[%c0_43, %c0_44, %c0_45], %109 {strides = array<i32>} : memref<2x8x32xf32, #tpu.memory_space<vmem>>, vector<2x8x32xf32>,
    %111 = vector.extract_strided_slice %66 {offsets = [0, 0, 0, 0], sizes = [1, 2, 8, 8], strides = [1, 1, 1, 1]} : vector<4x2x8x8xf32> to vector<1x2x8x8xf32>
    %112 = vector.shape_cast %111 : vector<1x2x8x8xf32> to vector<2x8x8xf32>
    %c0_46 = arith.constant 0 : index
    %c0_47 = arith.constant 0 : index
    %c0_48 = arith.constant 0 : index
    %c0_49 = arith.constant 0 : index
    %113 = vector.load %arg16[%c0_46, %c0_47, %c0_48, %c0_49] : memref<2x4x8x8xf32, #tpu.memory_space<vmem>>, vector<2x1x8x8xf32>
    %114 = vector.shape_cast %113 : vector<2x1x8x8xf32> to vector<2x8x8xf32>
    %115 = vector.shape_cast %112 : vector<2x8x8xf32> to vector<2x1x8x8xf32>
    tpu.vector_store %arg16[%c0_46, %c0_47, %c0_48, %c0_49], %115 {strides = array<i32>} : memref<2x4x8x8xf32, #tpu.memory_space<vmem>>, vector<2x1x8x8xf32>,
    %116 = vector.extract_strided_slice %66 {offsets = [1, 0, 0, 0], sizes = [1, 2, 8, 8], strides = [1, 1, 1, 1]} : vector<4x2x8x8xf32> to vector<1x2x8x8xf32>
    %117 = vector.shape_cast %116 : vector<1x2x8x8xf32> to vector<2x8x8xf32>
    %c0_50 = arith.constant 0 : index
    %c1 = arith.constant 1 : index
    %c0_51 = arith.constant 0 : index
    %c0_52 = arith.constant 0 : index
    %118 = vector.load %arg16[%c0_50, %c1, %c0_51, %c0_52] : memref<2x4x8x8xf32, #tpu.memory_space<vmem>>, vector<2x1x8x8xf32>
    %119 = vector.shape_cast %118 : vector<2x1x8x8xf32> to vector<2x8x8xf32>
    %120 = vector.shape_cast %117 : vector<2x8x8xf32> to vector<2x1x8x8xf32>
    tpu.vector_store %arg16[%c0_50, %c1, %c0_51, %c0_52], %120 {strides = array<i32>} : memref<2x4x8x8xf32, #tpu.memory_space<vmem>>, vector<2x1x8x8xf32>,
    %121 = vector.extract_strided_slice %66 {offsets = [2, 0, 0, 0], sizes = [1, 2, 8, 8], strides = [1, 1, 1, 1]} : vector<4x2x8x8xf32> to vector<1x2x8x8xf32>
    %122 = vector.shape_cast %121 : vector<1x2x8x8xf32> to vector<2x8x8xf32>
    %c0_53 = arith.constant 0 : index
    %c2 = arith.constant 2 : index
    %c0_54 = arith.constant 0 : index
    %c0_55 = arith.constant 0 : index
    %123 = vector.load %arg16[%c0_53, %c2, %c0_54, %c0_55] : memref<2x4x8x8xf32, #tpu.memory_space<vmem>>, vector<2x1x8x8xf32>
    %124 = vector.shape_cast %123 : vector<2x1x8x8xf32> to vector<2x8x8xf32>
    %125 = vector.shape_cast %122 : vector<2x8x8xf32> to vector<2x1x8x8xf32>
    tpu.vector_store %arg16[%c0_53, %c2, %c0_54, %c0_55], %125 {strides = array<i32>} : memref<2x4x8x8xf32, #tpu.memory_space<vmem>>, vector<2x1x8x8xf32>,
    %126 = vector.extract_strided_slice %66 {offsets = [3, 0, 0, 0], sizes = [1, 2, 8, 8], strides = [1, 1, 1, 1]} : vector<4x2x8x8xf32> to vector<1x2x8x8xf32>
    %127 = vector.shape_cast %126 : vector<1x2x8x8xf32> to vector<2x8x8xf32>
    %c0_56 = arith.constant 0 : index
    %c3 = arith.constant 3 : index
    %c0_57 = arith.constant 0 : index
    %c0_58 = arith.constant 0 : index
    %128 = vector.load %arg16[%c0_56, %c3, %c0_57, %c0_58] : memref<2x4x8x8xf32, #tpu.memory_space<vmem>>, vector<2x1x8x8xf32>
    %129 = vector.shape_cast %128 : vector<2x1x8x8xf32> to vector<2x8x8xf32>
    %130 = vector.shape_cast %127 : vector<2x8x8xf32> to vector<2x1x8x8xf32>
    tpu.vector_store %arg16[%c0_56, %c3, %c0_57, %c0_58], %130 {strides = array<i32>} : memref<2x4x8x8xf32, #tpu.memory_space<vmem>>, vector<2x1x8x8xf32>,
    return
  }
  func.func @transform_0(%arg0: i32) -> (i32, i32, i32) {
    %c0_i32 = arith.constant 0 : i32
    %c0_i32_0 = arith.constant 0 : i32
    %c0_i32_1 = arith.constant 0 : i32
    return %arg0, %c0_i32, %c0_i32_0 : i32, i32, i32
  }
  func.func @transform_1(%arg0: i32) -> (i32, i32, i32) {
    %c0_i32 = arith.constant 0 : i32
    %c0_i32_0 = arith.constant 0 : i32
    %c0_i32_1 = arith.constant 0 : i32
    return %arg0, %c0_i32, %c0_i32_0 : i32, i32, i32
  }
  func.func @transform_2(%arg0: i32) -> (i32, i32, i32) {
    %c0_i32 = arith.constant 0 : i32
    %c0_i32_0 = arith.constant 0 : i32
    %c0_i32_1 = arith.constant 0 : i32
    return %arg0, %c0_i32, %c0_i32_0 : i32, i32, i32
  }
  func.func @transform_3(%arg0: i32) -> (i32, i32, i32) {
    %c0_i32 = arith.constant 0 : i32
    %c0_i32_0 = arith.constant 0 : i32
    %c0_i32_1 = arith.constant 0 : i32
    return %arg0, %c0_i32, %c0_i32_0 : i32, i32, i32
  }
  func.func @transform_4(%arg0: i32) -> (i32, i32) {
    %c0_i32 = arith.constant 0 : i32
    %c0_i32_0 = arith.constant 0 : i32
    %c0_i32_1 = arith.constant 0 : i32
    return %c0_i32, %c0_i32_0 : i32, i32
  }
  func.func @transform_5(%arg0: i32) -> (i32, i32) {
    %c0_i32 = arith.constant 0 : i32
    %c0_i32_0 = arith.constant 0 : i32
    %c0_i32_1 = arith.constant 0 : i32
    return %c0_i32, %c0_i32_0 : i32, i32
  }
  func.func @transform_6(%arg0: i32) -> (i32, i32) {
    %c0_i32 = arith.constant 0 : i32
    %c0_i32_0 = arith.constant 0 : i32
    %c0_i32_1 = arith.constant 0 : i32
    return %c0_i32, %c0_i32_0 : i32, i32
  }
  func.func @transform_7(%arg0: i32) -> (i32, i32) {
    %c0_i32 = arith.constant 0 : i32
    %c0_i32_0 = arith.constant 0 : i32
    %c0_i32_1 = arith.constant 0 : i32
    return %c0_i32, %c0_i32_0 : i32, i32
  }
  func.func @transform_8(%arg0: i32) -> (i32, i32) {
    %c0_i32 = arith.constant 0 : i32
    %c0_i32_0 = arith.constant 0 : i32
    %c0_i32_1 = arith.constant 0 : i32
    return %c0_i32, %c0_i32_0 : i32, i32
  }
  func.func @transform_9(%arg0: i32) -> (i32, i32) {
    %c0_i32 = arith.constant 0 : i32
    %c0_i32_0 = arith.constant 0 : i32
    %c0_i32_1 = arith.constant 0 : i32
    return %c0_i32, %c0_i32_0 : i32, i32
  }
  func.func @transform_10(%arg0: i32) -> (i32, i32) {
    %c0_i32 = arith.constant 0 : i32
    %c0_i32_0 = arith.constant 0 : i32
    %c0_i32_1 = arith.constant 0 : i32
    return %c0_i32, %c0_i32_0 : i32, i32
  }
  func.func @transform_11(%arg0: i32) -> (i32, i32) {
    %c0_i32 = arith.constant 0 : i32
    %c0_i32_0 = arith.constant 0 : i32
    %c0_i32_1 = arith.constant 0 : i32
    return %c0_i32, %c0_i32_0 : i32, i32
  }
  func.func @transform_12(%arg0: i32) -> (i32, i32) {
    %c0_i32 = arith.constant 0 : i32
    %c0_i32_0 = arith.constant 0 : i32
    %c0_i32_1 = arith.constant 0 : i32
    return %c0_i32, %c0_i32_0 : i32, i32
  }
  func.func @transform_13(%arg0: i32) -> (i32, i32) {
    %c0_i32 = arith.constant 0 : i32
    %c0_i32_0 = arith.constant 0 : i32
    %c0_i32_1 = arith.constant 0 : i32
    return %c0_i32, %c0_i32_0 : i32, i32
  }
  func.func @transform_14(%arg0: i32) -> (i32, i32, i32) {
    %c0_i32 = arith.constant 0 : i32
    %c0_i32_0 = arith.constant 0 : i32
    %c0_i32_1 = arith.constant 0 : i32
    return %arg0, %c0_i32, %c0_i32_0 : i32, i32, i32
  }
  func.func @transform_15(%arg0: i32) -> (i32, i32, i32, i32) {
    %c0_i32 = arith.constant 0 : i32
    %c0_i32_0 = arith.constant 0 : i32
    %c0_i32_1 = arith.constant 0 : i32
    %c0_i32_2 = arith.constant 0 : i32
    return %arg0, %c0_i32, %c0_i32_0, %c0_i32_1 : i32, i32, i32, i32
  }
}

</mosaic_0001>

<bundles_post_ra>
// kernel: tpu_custom_call.1
= control target key start
LH: loop header
LB: loop body
LE: loop exit
PB: predicated region body
PF: predicated region fallthrough
CT: control target
= control target key end

     0   :  { %21 = vsyncpa [#allocation3], 0  ;;  %s2942_s0 = inlined_call_operand.hbm [shape: f32[2,8,32], index: 0, kind: input, shape index: {}]   ;;  %s2943_s1 = inlined_call_operand.hbm [shape: f32[2,8,32], index: 1, kind: input, shape index: {}]   ;;  %s2944_s2 = inlined_call_operand.hbm [shape: f32[2,8,32], index: 2, kind: input, shape index: {}]   ;;  %s2945_s3 = inlined_call_operand.hbm [shape: f32[2,8,8], index: 3, kind: input, shape index: {}]   ;;  %s2946_s4 = inlined_call_operand.hbm [shape: f32[32,32], index: 4, kind: input, shape index: {}]   ;;  %s2947_s5 = inlined_call_operand.vmem [shape: f32[1,32], index: 5, kind: input, shape index: {}]   ;;  %s2948_s6 = inlined_call_operand.hbm [shape: f32[32,32], index: 6, kind: input, shape index: {}]   ;;  %s2949_s7 = inlined_call_operand.vmem [shape: f32[1,32], index: 7, kind: input, shape index: {}]   ;;  %s2950_s8 = inlined_call_operand.hbm [shape: f32[32,32], index: 8, kind: input, shape index: {}]   ;;  %s2951_s9 = inlined_call_operand.vmem [shape: f32[1,32], index: 9, kind: input, shape index: {}]   ;;  %s2952_s10 = inlined_call_operand.vmem [shape: f32[32,32], index: 10, kind: input, shape index: {}]   ;;  %s2953_s11 = inlined_call_operand.vmem [shape: f32[1,32], index: 11, kind: input, shape index: {}]   ;;  %s2954_s12 = inlined_call_operand.vmem [shape: f32[1,32], index: 12, kind: input, shape index: {}]   ;;  %s2955_s13 = inlined_call_operand.vmem [shape: f32[1,32], index: 13, kind: input, shape index: {}]   ;;  %s2956_s14 = inlined_call_operand.hbm [shape: f32[2,8,32], index: 14, kind: output, shape index: {0}]   ;;  %s2957_s15 = inlined_call_operand.hbm [shape: f32[2,4,8,8], index: 15, kind: output, shape index: {1}]  }
   0x1   :  { %22 = vsyncpa [#allocation6], 0 }
   0x2   :  { %23 = vsyncpa [#allocation9], 0 }
   0x3   :  { %24 = vsyncpa [#allocation12], 0 }
   0x4   :  { %25 = vsyncpa [#allocation4], 0 }
   0x5   :  { %26 = vsyncpa [#allocation16], 0  ;;  %s2486_s18 = smov [#allocation5]   ;;  %s2487_s20 = smov [#allocation8]  }
   0x6   :  { %s44_s19 = sshll.u32 %s2486_s18, 4  ;;  %s68_s21 = sshll.u32 %s2487_s20, 4  ;;  %s45_s19 = int_to_ptr.vmem [resolvable:$true] %s44_s19  ;;  %s2584_s21 = int_to_ptr.vmem [resolvable:$true] %s68_s21 }
   0x7   :  { %s2276_s24 = scalar_lea.hbm %s2943_s1, 256 }
   0x8   :  { %p2277_p0 = scmp.ne.s32.totalorder %s2943_s1, %s2276_s24  ;;  %p2280_p1 = scmp.lt.u32.totalorder %s2276_s24, %s2943_s1 }
   0xa   :  { %p2282_p2 = pnand %p2280_p1, %p2277_p0 }
   0xc   :  { %2285 = shalt.err (!%p2282_p2)
}
   0xd   :  { %s2286_s29 = scalar_lea.vmem %s45_s19, 256  ;;  %p2291_p4 = scmp.lt.s32.totalorder %s45_s19, %s45_s19 }
   0xe   :  { %p2287_p3 = scmp.ne.s32.totalorder %s45_s19, %s2286_s29  ;;  %p2292_p5 = scmp.lt.s32.totalorder %s2286_s29, %s2286_s29 }
  0x10   :  { %p2293_p6 = por %p2292_p5, %p2291_p4 }
  0x12   :  { %p2294_p7 = pnand %p2293_p6, %p2287_p3 }
  0x14   :  { %2297 = shalt.err (!%p2294_p7)
}
  0x15   :  { %s2488_s30 = smov 128   ;;  %s2489_s16 = smov 8  }
  0x16   :  { %50 = dma.hbm_to_vmem [thread:$0]  %s2943_s1, 256, %s45_s19, [#allocation6], %s2488_s30, %s2488_s30, %s2489_s16  }
  0x17   :  { %s2298_s23 = scalar_lea.hbm %s2945_s3, 256 }
  0x18   :  { %p2299_p8 = scmp.ne.s32.totalorder %s2945_s3, %s2298_s23  ;;  %p2302_p9 = scmp.lt.u32.totalorder %s2298_s23, %s2945_s3 }
  0x1a   :  { %p2304_p10 = pnand %p2302_p9, %p2299_p8 }
  0x1c   :  { %2307 = shalt.err (!%p2304_p10)
}
  0x1d   :  { %s2308_s28 = scalar_lea.vmem %s2584_s21, 256  ;;  %p2313_p12 = scmp.lt.s32.totalorder %s2584_s21, %s2584_s21 }
  0x1e   :  { %p2309_p11 = scmp.ne.s32.totalorder %s2584_s21, %s2308_s28  ;;  %p2314_p13 = scmp.lt.s32.totalorder %s2308_s28, %s2308_s28 }
  0x20   :  { %p2315_p0 = por %p2314_p13, %p2313_p12 }
  0x22   :  { %p2316_p1 = pnand %p2315_p0, %p2309_p11 }
  0x24   :  { %2319 = shalt.err (!%p2316_p1)
}
  0x25   :  { %74 = dma.hbm_to_vmem [thread:$0]  %s2945_s3, 256, %s2584_s21, [#allocation9], %s2488_s30, %s2488_s30, %s2489_s16  }
  0x26   :  { %s2490_s29 = smov [#allocation11]   ;;  %s2491_s18 = smov [#allocation2]  }
  0x27   :  { %s94_s17 = sshll.u32 %s2490_s29, 4  ;;  %s32_s20 = sshll.u32 %s2491_s18, 4  ;;  %s95_s17 = int_to_ptr.vmem [resolvable:$true] %s94_s17  ;;  %s2621_s20 = int_to_ptr.vmem [resolvable:$true] %s32_s20 }
  0x28   :  { %s2320_s24 = scalar_lea.hbm %s2948_s6, 512 }
  0x29   :  { %p2321_p2 = scmp.ne.s32.totalorder %s2948_s6, %s2320_s24  ;;  %p2324_p3 = scmp.lt.u32.totalorder %s2320_s24, %s2948_s6 }
  0x2b   :  { %p2326_p4 = pnand %p2324_p3, %p2321_p2 }
  0x2d   :  { %2329 = shalt.err (!%p2326_p4)
}
  0x2e   :  { %s2330_s3 = scalar_lea.vmem %s95_s17, 512  ;;  %p2335_p6 = scmp.lt.s32.totalorder %s95_s17, %s95_s17 }
  0x2f   :  { %p2331_p5 = scmp.ne.s32.totalorder %s95_s17, %s2330_s3  ;;  %p2336_p7 = scmp.lt.s32.totalorder %s2330_s3, %s2330_s3 }
  0x31   :  { %p2337_p8 = por %p2336_p7, %p2335_p6 }
  0x33   :  { %p2338_p9 = pnand %p2337_p8, %p2331_p5 }
  0x35   :  { %2341 = shalt.err (!%p2338_p9)
}
  0x36   :  { %100 = dma.hbm_to_vmem [thread:$0]  %s2948_s6, 512, %s95_s17, [#allocation12], %s2488_s30, %s2488_s30, %s2489_s16  }
  0x37   :  { %s2342_s18 = scalar_lea.hbm %s2942_s0, 256 }
  0x38   :  { %p2343_p10 = scmp.ne.s32.totalorder %s2942_s0, %s2342_s18  ;;  %p2346_p11 = scmp.lt.u32.totalorder %s2342_s18, %s2942_s0 }
  0x3a   :  { %p2348_p12 = pnand %p2346_p11, %p2343_p10 }
  0x3c   :  { %2351 = shalt.err (!%p2348_p12)
}
  0x3d   :  { %s2352_s26 = scalar_lea.vmem %s2621_s20, 256  ;;  %p2357_p0 = scmp.lt.s32.totalorder %s2621_s20, %s2621_s20 }
  0x3e   :  { %p2353_p13 = scmp.ne.s32.totalorder %s2621_s20, %s2352_s26  ;;  %p2358_p1 = scmp.lt.s32.totalorder %s2352_s26, %s2352_s26 }
  0x40   :  { %p2359_p2 = por %p2358_p1, %p2357_p0 }
  0x42   :  { %p2360_p3 = pnand %p2359_p2, %p2353_p13 }
  0x44   :  { %2363 = shalt.err (!%p2360_p3)
}
  0x45   :  { %38 = dma.hbm_to_vmem [thread:$0]  %s2942_s0, 256, %s2621_s20, [#allocation3], %s2488_s30, %s2488_s30, %s2489_s16  }
  0x46   :  { %s2492_s27 = smov [#allocation7]   ;;  %s2493_s3 = smov [#allocation10]  }
  0x47   :  { %s56_s28 = sshll.u32 %s2492_s27, 4  ;;  %s80_s21 = sshll.u32 %s2493_s3, 4  ;;  %s57_s28 = int_to_ptr.vmem [resolvable:$true] %s56_s28  ;;  %s2658_s21 = int_to_ptr.vmem [resolvable:$true] %s80_s21 }
  0x48   :  { %s2364_s29 = scalar_lea.hbm %s2944_s2, 256 }
  0x49   :  { %p2365_p4 = scmp.ne.s32.totalorder %s2944_s2, %s2364_s29  ;;  %p2368_p5 = scmp.lt.u32.totalorder %s2364_s29, %s2944_s2 }
  0x4b   :  { %p2370_p6 = pnand %p2368_p5, %p2365_p4 }
  0x4d   :  { %2373 = shalt.err (!%p2370_p6)
}
  0x4e   :  { %s2374_s0 = scalar_lea.vmem %s57_s28, 256  ;;  %p2379_p8 = scmp.lt.s32.totalorder %s57_s28, %s57_s28 }
  0x4f   :  { %p2375_p7 = scmp.ne.s32.totalorder %s57_s28, %s2374_s0  ;;  %p2380_p9 = scmp.lt.s32.totalorder %s2374_s0, %s2374_s0 }
  0x51   :  { %p2381_p10 = por %p2380_p9, %p2379_p8 }
  0x53   :  { %p2382_p11 = pnand %p2381_p10, %p2375_p7 }
  0x55   :  { %2385 = shalt.err (!%p2382_p11)
}
  0x56   :  { %62 = dma.hbm_to_vmem [thread:$0]  %s2944_s2, 256, %s57_s28, [#allocation6], %s2488_s30, %s2488_s30, %s2489_s16  }
  0x57   :  { %s2386_s17 = scalar_lea.hbm %s2946_s4, 512 }
  0x58   :  { %p2387_p12 = scmp.ne.s32.totalorder %s2946_s4, %s2386_s17  ;;  %p2390_p13 = scmp.lt.u32.totalorder %s2386_s17, %s2946_s4 }
  0x5a   :  { %p2392_p0 = pnand %p2390_p13, %p2387_p12 }
  0x5c   :  { %2395 = shalt.err (!%p2392_p0)
}
  0x5d   :  { %s2396_s29 = scalar_lea.vmem %s2658_s21, 512  ;;  %p2401_p2 = scmp.lt.s32.totalorder %s2658_s21, %s2658_s21 }
  0x5e   :  { %p2397_p1 = scmp.ne.s32.totalorder %s2658_s21, %s2396_s29  ;;  %p2402_p3 = scmp.lt.s32.totalorder %s2396_s29, %s2396_s29 }
  0x60   :  { %p2403_p4 = por %p2402_p3, %p2401_p2 }
  0x62   :  { %p2404_p5 = pnand %p2403_p4, %p2397_p1 }
  0x64   :  { %2407 = shalt.err (!%p2404_p5)
}
  0x65   :  { %86 = dma.hbm_to_vmem [thread:$0]  %s2946_s4, 512, %s2658_s21, [#allocation9], %s2488_s30, %s2488_s30, %s2489_s16  }
  0x66   :  { %s2494_s18 = smov [#allocation13]   ;;  %s2408_s0 = scalar_lea.hbm %s2950_s8, 512 }
  0x67   :  { %s108_s22 = sshll.u32 %s2494_s18, 4  ;;  %p2409_p6 = scmp.ne.s32.totalorder %s2950_s8, %s2408_s0  ;;  %s109_s22 = int_to_ptr.vmem [resolvable:$true] %s108_s22 }
  0x68   :  { %p2412_p7 = scmp.lt.u32.totalorder %s2408_s0, %s2950_s8 }
  0x6a   :  { %p2414_p8 = pnand %p2412_p7, %p2409_p6 }
  0x6c   :  { %2417 = shalt.err (!%p2414_p8)
}
  0x6d   :  { %s2418_s17 = scalar_lea.vmem %s109_s22, 512  ;;  %p2423_p10 = scmp.lt.s32.totalorder %s109_s22, %s109_s22 }
  0x6e   :  { %p2419_p9 = scmp.ne.s32.totalorder %s109_s22, %s2418_s17  ;;  %p2424_p11 = scmp.lt.s32.totalorder %s2418_s17, %s2418_s17 }
  0x70   :  { %p2425_p12 = por %p2424_p11, %p2423_p10 }
  0x72   :  { %p2426_p13 = pnand %p2425_p12, %p2419_p9 }
  0x74   :  { %2429 = shalt.err (!%p2426_p13)
}
  0x75   :  { %114 = dma.hbm_to_vmem [thread:$0]  %s2950_s8, 512, %s109_s22, [#allocation12], %s2488_s30, %s2488_s30, %s2489_s16  }
  0x76   :  { %2474 = dma.done.wait [#allocation3], 256  }
  0x77   :  { %2475 = vsyncadd [#allocation3], 4294967040 }
  0x78   :  { %2476 = dma.done.wait [#allocation6], 512  }
  0x79   :  { %2477 = vsyncadd [#allocation6], 4294966784 }
  0x7a   :  { %2478 = dma.done.wait [#allocation9], 768  }
  0x7b   :  { %2479 = vsyncadd [#allocation9], 4294966528 }
  0x7c   :  { %2480 = dma.done.wait [#allocation12], 1024  }
  0x7d   :  { %2481 = vsyncadd [#allocation12], 4294966272  ;;  %v245_v0 = vld [vmem:[#allocation11] sm:$0xff]  ;;  %v246_v1 = vld [vmem:[#allocation11 + $0x8] sm:$0xff]  ;;  %vm163_vm0 = vcmask 261120   ;;  %v2495_v16 = vmov 0.0  }
  0x7e   :  { %v152_v2 = vld [vmem:[#allocation10] sm:$0xff]  ;;  %v2198_v3 = vpack.c.bf16 %v246_v1, %v245_v0  ;;  %v153_v4 = vld [vmem:[#allocation10 + $0x8] sm:$0xff]  ;;  %v247_v5 = vld [vmem:[#allocation11 + $0x10] sm:$0xff]  ;;  %vm2496_vm1 = vmmov 0   ;;  %vm477_vm2 = vcmask 64512   ;;  %s2499_s19 = smov 104  }
  0x7f   :  { %v248_v6 = vld [vmem:[#allocation11 + $0x18] sm:$0xff]  ;;  %v2190_v7 = vpack.c.bf16 %v153_v4, %v152_v2  ;;  %v154_v9 = vld [vmem:[#allocation10 + $0x10] sm:$0xff]  ;;  %v2711_v13 = vld [vmem:[#allocation2] sm:$0xff]  ;;  %s2500_s25 = smov 16   ;;  %vm1778_vm3 = vcmask 130048   ;;  %vm1781_vm4 = vcmask 195584  }
  0x80   :  { %v2202_v8 = vpack.c.bf16 %v248_v6, %v247_v5  ;;  %v155_v10 = vld [vmem:[#allocation10 + $0x18] sm:$0xff]  ;;  %v148_v11 = vld [vmem:[#allocation5] sm:$0xff]  ;;  %2199 = vmatprep.subr.bf16.mxu1 %v2198_v3  ;;  %2074 = vmatprep.mubr.msk.f32.mxu0 %vm163_vm0, %v2711_v13  ;;  %v2715_v15 = vld [vmem:[#allocation2 + $0x8] sm:$0xff] }
  0x81   :  { %v2194_v12 = vpack.c.bf16 %v155_v10, %v154_v9  ;;  %2085 = vmatprep.mubr.msk.f32.mxu1 %vm163_vm0, %v148_v11  ;;  %2201 = vmatpush3.bf16.msra.mxu1 %v2198_v3  ;;  %v149_v14 = vld [vmem:[#allocation5 + $0x8] sm:$0xff]  ;;  %v337_v17 = vld [vmem:[#allocation13] sm:$0xff]  ;;  %v338_v18 = vld [vmem:[#allocation13 + $0x8] sm:$0xff] }
  0x82   :  { %2191 = vmatprep.subr.bf16.mxu0 %v2190_v7  ;;  %2203 = vmatprep.subr.bf16.mxu1 %v2202_v8  ;;  %v2206_v19 = vpack.c.bf16 %v338_v18, %v337_v17  ;;  %v339_v20 = vld [vmem:[#allocation13 + $0x10] sm:$0xff]  ;;  %v340_v21 = vld [vmem:[#allocation13 + $0x18] sm:$0xff]  ;;  %v150_v23 = vld [vmem:[#allocation7] sm:$0xff] }
  0x83   :  { %2193 = vmatpush3.bf16.msra.mxu0 %v2190_v7  ;;  %v2210_v22 = vpack.c.bf16 %v340_v21, %v339_v20  ;;  %v1975_v24 = vld [vmem:[%s2949_s7] ss:$0 sm:$0xff]  ;;  %v151_v25 = vld [vmem:[#allocation7 + $0x8] sm:$0xff]  ;;  %s2497_s7 = smov 120   ;;  %v1070_v52 = vld [vmem:[#allocation8] sm:$0xff] }
  0x84   :  { %2195 = vmatprep.subr.bf16.mxu0 %v2194_v12  ;;  %v1972_v27 = vld [vmem:[%s2947_s5] ss:$0 sm:$0xff]  ;;  %s2498_s5 = smov 112   ;;  %v1071_v56 = vld [vmem:[#allocation8 + $0x8] sm:$0xff] }
  0x85   :  { %2205 = vmatpush3.bf16.msra.mxu1 %v2202_v8  ;;  %v1978_v48 = vld [vmem:[%s2951_s9] ss:$0 sm:$0xff] }
  0x86   :  { %2099 = vmatprep.subr.mxu1 %v2495_v16 }
  0x87   :  { %2197 = vmatpush3.bf16.msra.mxu0 %v2194_v12 }
  0x88   :  { %2086 = vmatmul.mubr.msk.f32.vlgmr.msra.gmra.mrb[0].mxu1 %vm163_vm0, %v149_v14  ;;  %2207 = vmatprep.subr.bf16.mxu0 %v2206_v19 }
  0x89   :  { %2101 = vmatprep.mubr.msk.f32.mxu1 %vm2496_vm1, %v2495_v16 }
  0x8a   :  { %2075 = vmatmul.mubr.msk.f32.vlgmr.msra.gmra.mrb[0].mxu0 %vm163_vm0, %v2715_v15 }
  0x8b   :  { %2209 = vmatpush3.bf16.msra.mxu0 %v2206_v19  ;;  %2096 = vmatprep.mubr.msk.f32.mxu0 %vm163_vm0, %v150_v23 }
  0x8c   :  { %2211 = vmatprep.subr.bf16.mxu0 %v2210_v22 }
  0x8f   :  { %2213 = vmatpush3.bf16.msra.mxu0 %v2210_v22 }
  0x90   :  { %2119 = vmatprep.subr.mxu0 %v2495_v16 }
  0x92   :  { %2097 = vmatmul.mubr.msk.f32.vlgmr.msra.gmra.mrb[2].mxu0 %vm163_vm0, %v151_v25 }
  0x93   :  { %2121 = vmatprep.mubr.msk.f32.mxu0 %vm2496_vm1, %v2495_v16 }
 0x15b   :  { %v2087_v26 = vpop.f32.mrb[0].mxu1 }
 0x15c   :  { %v334_v28 = vadd.f32 %v2087_v26, %v1975_v24  ;;  %v328_v29 = vpop.f32.mrb[1].mxu1 }
 0x15d   :  { %v2076_v30 = vpop.f32.mrb[0].mxu0  ;;  %v329_v31 = vadd.f32 %v1975_v24, %v328_v29 }
 0x15e   :  { %v236_v32 = vpop.f32.mrb[1].mxu0  ;;  %447 = vrot.lane.b32.xlu1 %v334_v28, %s2497_s7  ;;  %v242_v33 = vadd.f32 %v2076_v30, %v1972_v27 }
 0x15f   :  { %v237_v34 = vadd.f32 %v1972_v27, %v236_v32  ;;  %445 = vrot.lane.b32.xlu0 %v329_v31, %s2497_s7  ;;  %2100 = vmatpush3.xpose.msk.msra.mxu1 %vm477_vm2, %v329_v31 }
 0x160   :  { %2104 = vmatprep.subr.mxu1 %v2495_v16 }
 0x162   :  { %433 = vrot.lane.b32.xlu1 %v242_v33, %s2497_s7  ;;  %2102 = vmatmul.mubr.msk.f32.vlgmr.msra.gmra.mrb[2].mxu1 %vm477_vm2, %v237_v34 }
 0x163   :  { %431 = vrot.lane.b32.xlu0 %v237_v34, %s2497_s7  ;;  %2105 = vmatpush3.xpose.msk.msra.mxu1 %vm477_vm2, %v334_v28 }
 0x164   :  { %2106 = vmatprep.mubr.msk.f32.mxu1 %vm2496_vm1, %v2495_v16  ;;  %2109 = vmatprep.subr.mxu1 %v2495_v16 }
 0x165   :  { %v2098_v47 = vpop.f32.mrb[2].mxu0 }
 0x166   :  { %451 = vrot.lane.b32.xlu1 %v334_v28, %s2498_s5  ;;  %2107 = vmatmul.mubr.msk.f32.vlgmr.msra.gmra.mrb[4].mxu1 %vm477_vm2, %v242_v33  ;;  %v2789_v49 = vadd.f32 %v2098_v47, %v1978_v48  ;;  %v420_v50 = vpop.f32.mrb[3].mxu0 }
 0x167   :  { %449 = vrot.lane.b32.xlu0 %v329_v31, %s2498_s5  ;;  %2111 = vmatprep.mubr.msk.f32.mxu1 %vm2496_vm1, %v2495_v16  ;;  %v2791_v51 = vadd.f32 %v1978_v48, %v420_v50 }
 0x16a   :  { %437 = vrot.lane.b32.xlu1 %v242_v33, %s2498_s5 }
 0x16b   :  { %435 = vrot.lane.b32.xlu0 %v237_v34, %s2498_s5 }
 0x16e   :  { %455 = vrot.lane.b32.xlu1 %v334_v28, %s2499_s19 }
 0x16f   :  { %453 = vrot.lane.b32.xlu0 %v329_v31, %s2499_s19 }
 0x172   :  { %441 = vrot.lane.b32.xlu1 %v242_v33, %s2499_s19 }
 0x173   :  { %439 = vrot.lane.b32.xlu0 %v237_v34, %s2499_s19 }
 0x1d0   :  { %v448_v35 = vpop.permute.xlu1 %447 }
 0x1d1   :  { %v446_v36 = vpop.permute.xlu0 %445 }
 0x1d2   :  { %2110 = vmatpush3.xpose.msk.msra.mxu1 %vm477_vm2, %v446_v36 }
 0x1d3   :  { %2114 = vmatprep.subr.mxu1 %v2495_v16 }
 0x1d4   :  { %v434_v37 = vpop.permute.xlu1 %433 }
 0x1d5   :  { %v432_v38 = vpop.permute.xlu0 %431 }
 0x1d6   :  { %2112 = vmatmul.mubr.msk.f32.vlgmr.msra.gmra.mrb[6].mxu1 %vm477_vm2, %v432_v38 }
 0x1d7   :  { %2115 = vmatpush3.xpose.msk.msra.mxu1 %vm477_vm2, %v448_v35  ;;  %2116 = vmatprep.mubr.msk.f32.mxu1 %vm2496_vm1, %v2495_v16 }
 0x1d8   :  { %v452_v39 = vpop.permute.xlu1 %451  ;;  %2124 = vmatprep.subr.mxu1 %v2495_v16 }
 0x1d9   :  { %v450_v40 = vpop.permute.xlu0 %449 }
 0x1da   :  { %2117 = vmatmul.mubr.msk.f32.vlgmr.msra.gmra.mrb[8].mxu1 %vm477_vm2, %v434_v37  ;;  %2120 = vmatpush3.xpose.msk.msra.mxu0 %vm477_vm2, %v450_v40 }
 0x1db   :  { %2125 = vmatpush3.xpose.msk.msra.mxu1 %vm477_vm2, %v452_v39  ;;  %2126 = vmatprep.mubr.msk.f32.mxu1 %vm2496_vm1, %v2495_v16 }
 0x1dc   :  { %v438_v41 = vpop.permute.xlu1 %437  ;;  %2134 = vmatprep.subr.mxu1 %v2495_v16  ;;  %2129 = vmatprep.subr.mxu0 %v2495_v16 }
 0x1dd   :  { %v436_v42 = vpop.permute.xlu0 %435 }
 0x1de   :  { %2122 = vmatmul.mubr.msk.f32.vlgmr.msra.gmra.mrb[4].mxu0 %vm477_vm2, %v436_v42  ;;  %2127 = vmatmul.mubr.msk.f32.vlgmr.msra.gmra.mrb[10].mxu1 %vm477_vm2, %v438_v41 }
 0x1df   :  { %2136 = vmatprep.mubr.msk.f32.mxu1 %vm2496_vm1, %v2495_v16  ;;  %2131 = vmatprep.mubr.msk.f32.mxu0 %vm2496_vm1, %v2495_v16 }
 0x1e0   :  { %v456_v43 = vpop.permute.xlu1 %455 }
 0x1e1   :  { %v454_v44 = vpop.permute.xlu0 %453  ;;  %2135 = vmatpush3.xpose.msk.msra.mxu1 %vm477_vm2, %v456_v43 }
 0x1e2   :  { %2130 = vmatpush3.xpose.msk.msra.mxu0 %vm477_vm2, %v454_v44  ;;  %2144 = vmatprep.subr.mxu1 %v2495_v16 }
 0x1e3   :  { %2139 = vmatprep.subr.mxu0 %v2495_v16 }
 0x1e4   :  { %v442_v45 = vpop.permute.xlu1 %441 }
 0x1e5   :  { %v440_v46 = vpop.permute.xlu0 %439  ;;  %2137 = vmatmul.mubr.msk.f32.vlgmr.msra.gmra.mrb[12].mxu1 %vm477_vm2, %v442_v45 }
 0x1e6   :  { %2132 = vmatmul.mubr.msk.f32.vlgmr.msra.gmra.mrb[6].mxu0 %vm477_vm2, %v440_v46  ;;  %2146 = vmatprep.mubr.msk.f32.mxu1 %vm2496_vm1, %v2495_v16 }
 0x1e7   :  { %2141 = vmatprep.mubr.msk.f32.mxu0 %vm2496_vm1, %v2495_v16  ;;  %2145 = vmatpush3.msra.mxu1 %v2789_v49 }
 0x1e8   :  { %2140 = vmatpush3.msra.mxu0 %v2791_v51  ;;  %2154 = vmatprep.subr.mxu1 %v2495_v16 }
 0x1e9   :  { %2149 = vmatprep.subr.mxu0 %v2495_v16 }
 0x235   :  { %v548_v53 = vpop.f32.mrb[2].mxu1 }
 0x236   :  { %v1072_v54 = vadd.f32 %v1070_v52, %v548_v53  ;;  %v2103_v55 = vpop.f32.mrb[3].mxu1 }
 0x238   :  { %v1080_v57 = vsel %vm477_vm2, %v1072_v54, -inf }
 0x239   :  { %1081 = vmax.xlane.f32.xlu0 %v1080_v57  ;;  %v622_v58 = vpop.f32.mrb[4].mxu1 }
 0x23a   :  { %v1073_v59 = vadd.f32 %v1071_v56, %v622_v58  ;;  %v2108_v60 = vpop.f32.mrb[5].mxu1 }
 0x23c   :  { %v1083_v61 = vsel %vm477_vm2, %v1073_v59, -inf }
 0x23d   :  { %1084 = vmax.xlane.f32.xlu1 %v1083_v61 }
 0x2a9   :  { %v696_v62 = vpop.f32.mrb[6].mxu1 }
 0x2aa   :  { %v1074_v63 = vadd.f32 %v1070_v52, %v696_v62  ;;  %v2113_v0 = vpop.f32.mrb[7].mxu1 }
 0x2ac   :  { %v1086_v1 = vsel %vm477_vm2, %v1074_v63, -inf }
 0x2ad   :  { %1087 = vmax.xlane.f32.xlu0 %v1086_v1  ;;  %v770_v2 = vpop.f32.mrb[8].mxu1 }
 0x2ae   :  { %v1075_v3 = vadd.f32 %v1071_v56, %v770_v2  ;;  %v2118_v4 = vpop.f32.mrb[9].mxu1 }
 0x2b0   :  { %v1089_v5 = vsel %vm477_vm2, %v1075_v3, -inf }
 0x2b1   :  { %v844_v6 = vpop.f32.mrb[4].mxu0  ;;  %1090 = vmax.xlane.f32.xlu0 %v1089_v5  ;;  %v918_v7 = vpop.f32.mrb[10].mxu1 }
 0x2b2   :  { %v1076_v8 = vadd.f32 %v1070_v52, %v844_v6  ;;  %v1077_v9 = vadd.f32 %v1071_v56, %v918_v7  ;;  %v2123_v10 = vpop.f32.mrb[5].mxu0  ;;  %v2128_v11 = vpop.f32.mrb[11].mxu1 }
 0x2b4   :  { %v1092_v12 = vsel %vm477_vm2, %v1076_v8, -inf  ;;  %v1095_v14 = vsel %vm477_vm2, %v1077_v9, -inf }
 0x2b5   :  { %1093 = vmax.xlane.f32.xlu1 %v1092_v12  ;;  %1096 = vmax.xlane.f32.xlu0 %v1095_v14 }
 0x2b8   :  { %v1066_v17 = vpop.f32.mrb[12].mxu1 }
 0x2b9   :  { %v1079_v18 = vadd.f32 %v1071_v56, %v1066_v17  ;;  %v992_v19 = vpop.f32.mrb[6].mxu0  ;;  %v2138_v20 = vpop.f32.mrb[13].mxu1 }
 0x2ba   :  { %v1078_v21 = vadd.f32 %v1070_v52, %v992_v19  ;;  %v2133_v22 = vpop.f32.mrb[7].mxu0 }
 0x2bb   :  { %v1101_v23 = vsel %vm477_vm2, %v1079_v18, -inf }
 0x2bc   :  { %1102 = vmax.xlane.f32.xlu0 %v1101_v23  ;;  %v1098_v24 = vsel %vm477_vm2, %v1078_v21, -inf }
 0x2bd   :  { %1099 = vmax.xlane.f32.xlu1 %v1098_v24 }
 0x2c6   :  { %v1082_v28 = vpop.xlane.xlu0 %1081 }
 0x2c7   :  { %v1104_v29 = vsub.f32 %v1072_v54, %v1082_v28 }
 0x2c9   :  { %v1112_v30 = vmul.f32 1.442695, %v1104_v29 }
 0x2ca   :  { %v1085_v25 = vpop.xlane.xlu1 %1084 }
 0x2cb   :  { %v1105_v26 = vsub.f32 %v1073_v59, %v1085_v25 }
 0x2cd   :  { %v1114_v27 = vmul.f32 1.442695, %v1105_v26 }
 0x2ce   :  { %459 = vrot.lane.b32.xlu1 %v2791_v51, %s2497_s7 }
 0x2cf   :  { %2240 = vpow2.f32 %v1114_v27 }
 0x2d0   :  { %2242 = vpow2.f32 %v1112_v30 }
 0x2d2   :  { %465 = vrot.lane.b32.xlu1 %v2791_v51, %s2498_s5  ;;  %461 = vrot.lane.b32.xlu0 %v2789_v49, %s2497_s7 }
 0x2d6   :  { %467 = vrot.lane.b32.xlu1 %v2789_v49, %s2498_s5 }
 0x2d9   :  { %v2241_v31 = vpop.eup %2240 }
 0x2da   :  { %v1131_v32 = vsel %vm477_vm2, %v2241_v31, 0.0  ;;  %v2814_v33 = vpop.eup %2242 }
 0x2db   :  { %v1128_v34 = vsel %vm477_vm2, %v2814_v33, 0.0 }
 0x2f1   :  { %1132 = vadd.xlane.f32.xlu0 %v1131_v32 }
 0x2fa   :  { %1129 = vadd.xlane.f32.xlu1 %v1128_v34 }
 0x33a   :  { %v1088_v35 = vpop.xlane.xlu0 %1087 }
 0x33b   :  { %v1106_v36 = vsub.f32 %v1074_v63, %v1088_v35 }
 0x33d   :  { %v1116_v37 = vmul.f32 1.442695, %v1106_v36 }
 0x33e   :  { %v1091_v38 = vpop.xlane.xlu0 %1090 }
 0x33f   :  { %2244 = vpow2.f32 %v1116_v37  ;;  %v1107_v39 = vsub.f32 %v1075_v3, %v1091_v38  ;;  %v1785_v38 = vld [vmem:[%s2952_s10 + $0x8] sm:$0xff] }
 0x341   :  { %v1118_v40 = vmul.f32 1.442695, %v1107_v39  ;;  %v1786_v39 = vld [vmem:[%s2952_s10 + $0x10] sm:$0xff] }
 0x342   :  { %v1094_v41 = vpop.xlane.xlu1 %1093  ;;  %v1097_v42 = vpop.xlane.xlu0 %1096 }
 0x343   :  { %2246 = vpow2.f32 %v1118_v40  ;;  %v1108_v43 = vsub.f32 %v1076_v8, %v1094_v41  ;;  %v1109_v44 = vsub.f32 %v1077_v9, %v1097_v42  ;;  %v1787_v41 = vld [vmem:[%s2952_s10 + $0x18] sm:$0xff] }
 0x344   :  { %v2218_v42 = vpack.c.bf16 %v1787_v41, %v1786_v39 }
 0x345   :  { %v1120_v45 = vmul.f32 1.442695, %v1108_v43  ;;  %v1122_v46 = vmul.f32 1.442695, %v1109_v44 }
 0x347   :  { %2248 = vpow2.f32 %v1120_v45 }
 0x348   :  { %2250 = vpow2.f32 %v1122_v46 }
 0x349   :  { %v2245_v47 = vpop.eup %2244  ;;  %v1103_v48 = vpop.xlane.xlu0 %1102 }
 0x34a   :  { %v1111_v50 = vsub.f32 %v1079_v18, %v1103_v48  ;;  %v1100_v52 = vpop.xlane.xlu1 %1099  ;;  %v1134_v53 = vsel %vm477_vm2, %v2245_v47, 0.0 }
 0x34b   :  { %v1110_v54 = vsub.f32 %v1078_v21, %v1100_v52  ;;  %1135 = vadd.xlane.f32.xlu1 %v1134_v53 }
 0x34c   :  { %v1126_v55 = vmul.f32 1.442695, %v1111_v50 }
 0x34d   :  { %v2247_v56 = vpop.eup %2246  ;;  %v1124_v57 = vmul.f32 1.442695, %v1110_v54  ;;  %v462_v4 = vpop.permute.xlu0 %461 }
 0x34e   :  { %2252 = vpow2.f32 %v1126_v55  ;;  %v1137_v58 = vsel %vm477_vm2, %v2247_v56, 0.0  ;;  %v460_v3 = vpop.permute.xlu1 %459 }
 0x34f   :  { %2254 = vpow2.f32 %v1124_v57  ;;  %1138 = vadd.xlane.f32.xlu0 %v1137_v58 }
 0x351   :  { %v2820_v59 = vpop.eup %2248 }
 0x352   :  { %v2822_v60 = vpop.eup %2250  ;;  %v1140_v61 = vsel %vm477_vm2, %v2820_v59, 0.0  ;;  %v466_v5 = vpop.permute.xlu1 %465 }
 0x353   :  { %1141 = vadd.xlane.f32.xlu1 %v1140_v61  ;;  %v1143_v62 = vsel %vm477_vm2, %v2822_v60, 0.0 }
 0x354   :  { %1144 = vadd.xlane.f32.xlu0 %v1143_v62 }
 0x356   :  { %v468_v7 = vpop.permute.xlu1 %467 }
 0x358   :  { %v2828_v63 = vpop.eup %2252 }
 0x359   :  { %v2830_v0 = vpop.eup %2254  ;;  %v1149_v1 = vsel %vm477_vm2, %v2828_v63, 0.0 }
 0x35a   :  { %1150 = vadd.xlane.f32.xlu0 %v1149_v1  ;;  %v1146_v2 = vsel %vm477_vm2, %v2830_v0, 0.0 }
 0x35b   :  { %1147 = vadd.xlane.f32.xlu1 %v1146_v2 }
 0x36c   :  { %473 = vrot.lane.b32.xlu1 %v2789_v49, %s2499_s19 }
 0x370   :  { %471 = vrot.lane.b32.xlu0 %v2791_v51, %s2499_s19 }
 0x37e   :  { %v1133_v6 = vpop.xlane.xlu0 %1132 }
 0x37f   :  { %2256 = vrcp.f32 %v1133_v6 }
 0x387   :  { %v1130_v8 = vpop.xlane.xlu1 %1129 }
 0x388   :  { %2258 = vrcp.f32 %v1130_v8 }
 0x389   :  { %v2257_v9 = vpop.eup %2256 }
 0x38a   :  { %v1161_v10 = vmul.f32 %v2257_v9, %v2241_v31 }
 0x38c   :  { %1926 = vst.msk [vmem:[#allocation15 + $0x20] sm:$0xff] %vm477_vm2, %v1161_v10  ;;  %2147 = vmatmul.mubr.msk.f32.vlgmr.msra.gmra.mrb[14].mxu1 %vm477_vm2, %v1161_v10 }
 0x38d   :  { %2155 = vmatpush3.msra.mxu1 %v462_v4  ;;  %2156 = vmatprep.mubr.msk.f32.mxu1 %vm2496_vm1, %v2495_v16 }
 0x38e   :  { %2164 = vmatprep.subr.mxu1 %v2495_v16 }
 0x392   :  { %v2259_v49 = vpop.eup %2258 }
 0x393   :  { %v1160_v51 = vmul.f32 %v2259_v49, %v2814_v33 }
 0x395   :  { %1925 = vst.msk [vmem:[#allocation15] sm:$0xff] %vm477_vm2, %v1160_v51  ;;  %2142 = vmatmul.mubr.msk.f32.vlgmr.msra.gmra.mrb[8].mxu0 %vm477_vm2, %v1160_v51 }
 0x396   :  { %2150 = vmatpush3.msra.mxu0 %v460_v3  ;;  %2151 = vmatprep.mubr.msk.f32.mxu0 %vm2496_vm1, %v2495_v16 }
 0x397   :  { %2159 = vmatprep.subr.mxu0 %v2495_v16 }
 0x3d8   :  { %v1136_v11 = vpop.xlane.xlu1 %1135 }
 0x3d9   :  { %2260 = vrcp.f32 %v1136_v11 }
 0x3dc   :  { %v1139_v12 = vpop.xlane.xlu0 %1138 }
 0x3dd   :  { %2262 = vrcp.f32 %v1139_v12 }
 0x3e0   :  { %v1142_v14 = vpop.xlane.xlu1 %1141 }
 0x3e1   :  { %2264 = vrcp.f32 %v1142_v14  ;;  %v1145_v17 = vpop.xlane.xlu0 %1144 }
 0x3e2   :  { %2266 = vrcp.f32 %v1145_v17 }
 0x3e3   :  { %v2261_v18 = vpop.eup %2260 }
 0x3e4   :  { %v1162_v19 = vmul.f32 %v2261_v18, %v2245_v47 }
 0x3e6   :  { %1928 = vst.msk [vmem:[#allocation15 + $0x8] sm:$0xff] %vm477_vm2, %v1162_v19  ;;  %2152 = vmatmul.mubr.msk.f32.vlgmr.msra.gmra.mrb[10].mxu0 %vm477_vm2, %v1162_v19 }
 0x3e7   :  { %v2263_v20 = vpop.eup %2262  ;;  %2160 = vmatpush3.msra.mxu0 %v466_v5  ;;  %v1151_v21 = vpop.xlane.xlu0 %1150  ;;  %2161 = vmatprep.mubr.msk.f32.mxu0 %vm2496_vm1, %v2495_v16  ;;  %v2005_v5 = vld [vmem:[%s2953_s11] ss:$0 sm:$0xff]  ;;  %s2502_s11 = smov [#allocation15]  }
 0x3e8   :  { %v1163_v22 = vmul.f32 %v2263_v20, %v2247_v56  ;;  %2268 = vrcp.f32 %v1151_v21  ;;  %v1148_v23 = vpop.xlane.xlu1 %1147  ;;  %2169 = vmatprep.subr.mxu0 %v2495_v16  ;;  %s1953_s17 = sshll.u32 %s2502_s11, 4  ;;  %s1954_s17 = int_to_ptr.vmem [resolvable:$true] %s1953_s17 }
 0x3e9   :  { %2270 = vrcp.f32 %v1148_v23  ;;  %s2430_s4 = scalar_lea.vmem %s1954_s17, 1024  ;;  %p2435_p1 = scmp.lt.s32.totalorder %s1954_s17, %s1954_s17 }
 0x3ea   :  { %1929 = vst.msk [vmem:[#allocation15 + $0x28] sm:$0xff] %vm477_vm2, %v1163_v22  ;;  %2157 = vmatmul.mubr.msk.f32.vlgmr.msra.gmra.mrb[16].mxu1 %vm477_vm2, %v1163_v22  ;;  %p2431_p0 = scmp.ne.s32.totalorder %s1954_s17, %s2430_s4  ;;  %p2436_p2 = scmp.lt.s32.totalorder %s2430_s4, %s2430_s4 }
 0x3eb   :  { %v2265_v24 = vpop.eup %2264  ;;  %2165 = vmatpush3.msra.mxu1 %v468_v7  ;;  %2166 = vmatprep.mubr.msk.f32.mxu1 %vm2496_vm1, %v2495_v16  ;;  %v472_v29 = vpop.permute.xlu0 %471 }
 0x3ec   :  { %v2267_v25 = vpop.eup %2266  ;;  %v1164_v26 = vmul.f32 %v2265_v24, %v2820_v59  ;;  %2174 = vmatprep.subr.mxu1 %v2495_v16  ;;  %v474_v28 = vpop.permute.xlu1 %473  ;;  %p2437_p3 = por %p2436_p2, %p2435_p1 }
 0x3ed   :  { %v1165_v27 = vmul.f32 %v2267_v25, %v2822_v60 }
 0x3ee   :  { %1931 = vst.msk [vmem:[#allocation15 + $0x10] sm:$0xff] %vm477_vm2, %v1164_v26  ;;  %2162 = vmatmul.mubr.msk.f32.vlgmr.msra.gmra.mrb[12].mxu0 %vm477_vm2, %v1164_v26  ;;  %p2438_p4 = pnand %p2437_p3, %p2431_p0 }
 0x3ef   :  { %1932 = vst.msk [vmem:[#allocation15 + $0x30] sm:$0xff] %vm477_vm2, %v1165_v27  ;;  %2167 = vmatmul.mubr.msk.f32.vlgmr.msra.gmra.mrb[18].mxu1 %vm477_vm2, %v1165_v27  ;;  %2170 = vmatpush3.msra.mxu0 %v472_v29 }
 0x3f0   :  { %2175 = vmatpush3.msra.mxu1 %v474_v28  ;;  %2176 = vmatprep.mubr.msk.f32.mxu1 %vm2496_vm1, %v2495_v16 }
 0x3f1   :  { %2171 = vmatprep.mubr.msk.f32.mxu0 %vm2496_vm1, %v2495_v16  ;;  %v1784_v16 = vld [vmem:[%s2952_s10] sm:$0xff]  ;;  %s2501_s10 = smov 24  }
 0x3f2   :  { %v2269_v30 = vpop.eup %2268  ;;  %v2214_v40 = vpack.c.bf16 %v1785_v38, %v1784_v16 }
 0x3f3   :  { %v2271_v31 = vpop.eup %2270  ;;  %v1167_v32 = vmul.f32 %v2269_v30, %v2828_v63 }
 0x3f4   :  { %v1166_v33 = vmul.f32 %v2271_v31, %v2830_v0  ;;  %2215 = vmatprep.subr.bf16.mxu0 %v2214_v40 }
 0x3f5   :  { %1935 = vst.msk [vmem:[#allocation15 + $0x38] sm:$0xff] %vm477_vm2, %v1167_v32  ;;  %2177 = vmatmul.mubr.msk.f32.vlgmr.msra.gmra.mrb[20].mxu1 %vm477_vm2, %v1167_v32 }
 0x3f6   :  { %1934 = vst.msk [vmem:[#allocation15 + $0x18] sm:$0xff] %vm477_vm2, %v1166_v33  ;;  %2172 = vmatmul.mubr.msk.f32.vlgmr.msra.gmra.mrb[14].mxu0 %vm477_vm2, %v1166_v33 }
 0x3f7   :  { %2217 = vmatpush3.bf16.msra.mxu0 %v2214_v40 }
 0x3f8   :  { %2219 = vmatprep.subr.bf16.mxu0 %v2218_v42 }
 0x3fb   :  { %2221 = vmatpush3.bf16.msra.mxu0 %v2218_v42 }
 0x45f   :  { %v1310_v34 = vpop.f32.mrb[14].mxu1 }
 0x460   :  { %v2148_v35 = vpop.f32.mrb[15].mxu1 }
 0x468   :  { %v1237_v36 = vpop.f32.mrb[8].mxu0 }
 0x469   :  { %v2143_v37 = vpop.f32.mrb[9].mxu0 }
 0x4b9   :  { %v1383_v43 = vpop.f32.mrb[10].mxu0 }
 0x4ba   :  { %v2153_v44 = vpop.f32.mrb[11].mxu0  ;;  %1754 = vrot.lane.b32.xlu0 %v1383_v43, %s2489_s16 }
 0x4bd   :  { %v1456_v45 = vpop.f32.mrb[16].mxu1 }
 0x4be   :  { %1756 = vrot.lane.b32.xlu1 %v1456_v45, %s2489_s16  ;;  %v2158_v46 = vpop.f32.mrb[17].mxu1 }
 0x4c1   :  { %v1529_v47 = vpop.f32.mrb[12].mxu0 }
 0x4c2   :  { %v1602_v48 = vpop.f32.mrb[18].mxu1  ;;  %v2163_v50 = vpop.f32.mrb[13].mxu0  ;;  %1762 = vrot.lane.b32.xlu0 %v1529_v47, %s2500_s25 }
 0x4c3   :  { %1764 = vrot.lane.b32.xlu1 %v1602_v48, %s2500_s25  ;;  %v2168_v52 = vpop.f32.mrb[19].mxu1 }
 0x4c8   :  { %v1748_v53 = vpop.f32.mrb[20].mxu1 }
 0x4c9   :  { %v1675_v54 = vpop.f32.mrb[14].mxu0  ;;  %1772 = vrot.lane.b32.xlu1 %v1748_v53, %s2501_s10  ;;  %v2178_v55 = vpop.f32.mrb[21].mxu1 }
 0x4ca   :  { %1770 = vrot.lane.b32.xlu0 %v1675_v54, %s2501_s10  ;;  %v2173_v56 = vpop.f32.mrb[15].mxu0 }
 0x52c   :  { %v1755_v58 = vpop.permute.xlu0 %1754 }
 0x52d   :  { %v1776_v61 = vsel %vm477_vm2, %v1237_v36, %v1755_v58 }
 0x530   :  { %v1757_v57 = vpop.permute.xlu1 %1756 }
 0x531   :  { %v1777_v63 = vsel %vm477_vm2, %v1310_v34, %v1757_v57 }
 0x534   :  { %v1763_v60 = vpop.permute.xlu0 %1762 }
 0x535   :  { %v1765_v59 = vpop.permute.xlu1 %1764  ;;  %v1779_v0 = vsel %vm1778_vm3, %v1776_v61, %v1763_v60 }
 0x536   :  { %v1780_v2 = vsel %vm1778_vm3, %v1777_v63, %v1765_v59 }
 0x53b   :  { %v1773_v62 = vpop.permute.xlu1 %1772 }
 0x53c   :  { %v1771_v1 = vpop.permute.xlu0 %1770  ;;  %v1783_v4 = vsel %vm1781_vm4, %v1780_v2, %v1773_v62 }
 0x53d   :  { %v1782_v3 = vsel %vm1781_vm4, %v1779_v0, %v1771_v1 }
 0x53e   :  { %2187 = vmatprep.mubr.msk.f32.mxu0 %vm163_vm0, %v1782_v3 }
 0x53f   :  { %2188 = vmatmul.mubr.msk.f32.vlgmr.msra.gmra.mrb[16].mxu0 %vm163_vm0, %v1783_v4 }
 0x612   :  { %v2189_v6 = vpop.f32.mrb[16].mxu0 }
 0x613   :  { %v1873_v7 = vadd.f32 %v2189_v6, %v2005_v5  ;;  %v1867_v8 = vpop.f32.mrb[17].mxu0 }
 0x614   :  { %v1868_v9 = vadd.f32 %v2005_v5, %v1867_v8 }
 0x615   :  { %v1877_v10 = vadd.f32 %v1873_v7, %v2715_v15 }
 0x616   :  { %v1876_v49 = vadd.f32 %v1868_v9, %v2711_v13 }
 0x617   :  { %v1881_v51 = vsel %vm163_vm0, %v1877_v10, 0.0 }
 0x618   :  { %1882 = vadd.xlane.f32.xlu1 %v1881_v51  ;;  %v1878_v11 = vsel %vm163_vm0, %v1876_v49, 0.0 }
 0x619   :  { %1879 = vadd.xlane.f32.xlu0 %v1878_v11 }
 0x6a5   :  { %v1883_v12 = vpop.xlane.xlu1 %1882 }
 0x6a6   :  { %v1886_v14 = vmul.f32 0.03125, %v1883_v12  ;;  %v1880_v17 = vpop.xlane.xlu0 %1879 }
 0x6a7   :  { %v1885_v18 = vmul.f32 0.03125, %v1880_v17 }
 0x6a8   :  { %v1888_v19 = vsub.f32 %v1877_v10, %v1886_v14 }
 0x6a9   :  { %v1887_v20 = vsub.f32 %v1876_v49, %v1885_v18 }
 0x6aa   :  { %v1890_v23 = vmul.f32 %v1888_v19, %v1888_v19 }
 0x6ab   :  { %v1889_v21 = vmul.f32 %v1887_v20, %v1887_v20 }
 0x6ac   :  { %v1894_v15 = vsel %vm163_vm0, %v1890_v23, 0.0 }
 0x6ad   :  { %v1891_v22 = vsel %vm163_vm0, %v1889_v21, 0.0 }
 0x6ae   :  { %1892 = vadd.xlane.f32.xlu0 %v1891_v22 }
 0x6b2   :  { %1895 = vadd.xlane.f32.xlu0 %v1894_v15 }
 0x6b3   :  { %2441 = shalt.err (!%p2438_p4)
}
 0x6b4   :  { %s2442_s27 = scalar_lea.hbm %s2957_s15, 1024 }
 0x6b5   :  { %p2443_p5 = scmp.ne.s32.totalorder %s2957_s15, %s2442_s27  ;;  %p2446_p6 = scmp.lt.u32.totalorder %s2442_s27, %s2957_s15 }
 0x6b7   :  { %p2448_p7 = pnand %p2446_p6, %p2443_p5 }
 0x6b9   :  { %2451 = shalt.err (!%p2448_p7)
}
 0x6ba   :  { %1959 = dma.vmem_to_hbm [thread:$0]  %s1954_s17, 1024, %s2957_s15, [#allocation16], %s2488_s30, %s2488_s30, %s2489_s16  }
 0x6bb   :  { %v2008_v30 = vld [vmem:[%s2954_s12] ss:$0 sm:$0xff]  ;;  %s2503_s15 = smov [#allocation14]  }
 0x6bc   :  { %v2009_v32 = vld [vmem:[%s2955_s13] ss:$0 sm:$0xff]  ;;  %s1941_s22 = sshll.u32 %s2503_s15, 4  ;;  %s1942_s22 = int_to_ptr.vmem [resolvable:$true] %s1941_s22 }
 0x6bd   :  { %s2452_s23 = scalar_lea.vmem %s1942_s22, 256  ;;  %p2457_p9 = scmp.lt.s32.totalorder %s1942_s22, %s1942_s22 }
 0x6be   :  { %p2453_p8 = scmp.ne.s32.totalorder %s1942_s22, %s2452_s23  ;;  %p2458_p10 = scmp.lt.s32.totalorder %s2452_s23, %s2452_s23 }
 0x6c0   :  { %p2459_p11 = por %p2458_p10, %p2457_p9 }
 0x6c2   :  { %p2460_p12 = pnand %p2459_p11, %p2453_p8 }
 0x73b   :  { %v1893_v13 = vpop.xlane.xlu0 %1892 }
 0x73c   :  { %v1897_v24 = vmul.f32 0.03125, %v1893_v13 }
 0x73e   :  { %v1899_v25 = vadd.f32 1e-05, %v1897_v24 }
 0x73f   :  { %v1896_v26 = vpop.xlane.xlu0 %1895 }
 0x740   :  { %2272 = vrsqrt.f32 %v1899_v25  ;;  %v1898_v27 = vmul.f32 0.03125, %v1896_v26 }
 0x742   :  { %v1900_v28 = vadd.f32 1e-05, %v1898_v27 }
 0x744   :  { %2274 = vrsqrt.f32 %v1900_v28 }
 0x74a   :  { %v2273_v29 = vpop.eup %2272 }
 0x74b   :  { %v1903_v31 = vmul.f32 %v2273_v29, %v1887_v20 }
 0x74d   :  { %v1912_v33 = vmul.f32 %v2008_v30, %v1903_v31 }
 0x74e   :  { %v2275_v34 = vpop.eup %2274 }
 0x74f   :  { %v1904_v35 = vmul.f32 %v2275_v34, %v1888_v19  ;;  %v1921_v36 = vadd.f32 %v2009_v32, %v1912_v33 }
 0x751   :  { %v1913_v37 = vmul.f32 %v2008_v30, %v1904_v35  ;;  %1923 = vst.msk [vmem:[#allocation14] sm:$0xff] %vm163_vm0, %v1921_v36 }
 0x753   :  { %v1922_v16 = vadd.f32 %v2009_v32, %v1913_v37 }
 0x755   :  { %1924 = vst.msk [vmem:[#allocation14 + $0x8] sm:$0xff] %vm163_vm0, %v1922_v16 }
 0x756   :  { %2463 = shalt.err (!%p2460_p12)
}
 0x757   :  { %s2464_s24 = scalar_lea.hbm %s2956_s14, 256 }
 0x758   :  { %p2465_p13 = scmp.ne.s32.totalorder %s2956_s14, %s2464_s24  ;;  %p2468_p0 = scmp.lt.u32.totalorder %s2464_s24, %s2956_s14 }
 0x75a   :  { %p2470_p1 = pnand %p2468_p0, %p2465_p13 }
 0x75c   :  { %2473 = shalt.err (!%p2470_p1)
}
 0x75d   :  { %1947 = dma.vmem_to_hbm [thread:$0]  %s1942_s22, 256, %s2956_s14, [#allocation4], %s2488_s30, %s2488_s30, %s2489_s16  }
 0x75e   :  { %2482 = dma.done.wait [#allocation4], 256  }
 0x75f   :  { %2483 = vsyncadd [#allocation4], 4294967040 }
 0x760   :  { %2484 = dma.done.wait [#allocation16], 1024  }
 0x761   :  { %2485 = vsyncadd [#allocation16], 4294966272 }
 0x762   :  { %1966 = vsyncpa [#allocation3], 1 }
 0x763   :  { %1967 = vsyncpa [#allocation6], 1 }
 0x764   :  { %1968 = vsyncpa [#allocation9], 1 }
 0x765   :  { %1969 = vsyncpa [#allocation12], 1 }
 0x766   :  { %1970 = vsyncpa [#allocation4], 1 }
 0x767   :  { %1971 = vsyncpa [#allocation16], 1 }

</bundles_post_ra>
